<compile_context>
chip_gen: v6e
topology: v6e:2x2x1
jax: 0.10.0
libtpu: 0.0.40
codegen_flags: <defaults>
</compile_context>

<pallas_src>
import functools

import jax
import jax.numpy as jnp
from jax.experimental import pallas as pl
from jax.experimental.pallas import tpu as pltpu


# ----------------------------- fused kernel ----------------------------------

def block_kernel(x_ref, w1_ref, w2_ref, bias_ref, o_ref, pad_ref, *, Nps, H, W, C):
    """x_ref / o_ref: (Nps, H, W*C) f32      w*_ref: (3, (W+2)*C, W*C) bf16
    bias_ref: (1, W*C) f32                   pad_ref: VMEM (Nps*(H+2), (W+2)*C) f32

    Padded-row column layout (lane aligned):
      [ interior 0 : W*C  |  left halo (C cols, zero)  |  right halo (C cols, zero) ]
    """
    WC = W * C
    S = H + 2                       # per-image row stride inside the scratch
    R = Nps * S                     # total scratch rows
    M = R - 2                       # matmul M; rows n*S+H, n*S+H+1 are garbage

    bias = bias_ref[...]            # (1, WC) f32, broadcasts over rows

    # ---- zero only the halo; the interior is fully overwritten right below ----
    pad_ref[pl.ds(0, R), pl.ds(WC, 2 * C)] = jnp.zeros((R, 2 * C), jnp.float32)
    zrow = jnp.zeros((1, WC), jnp.float32)
    for n in range(Nps):                                        # static unroll
        pad_ref[pl.ds(n * S, 1), pl.ds(0, WC)] = zrow               # top halo row
        pad_ref[pl.ds(n * S + H + 1, 1), pl.ds(0, WC)] = zrow       # bottom halo row

    # ---- scatter the batch into the scratch interior (dense 128-lane stores) ----
    for n in range(Nps):
        pad_ref[pl.ds(n * S + 1, H), pl.ds(0, WC)] = x_ref[n].astype(jnp.float32)

    def conv(w_ref):
        """3x3 conv as 3 MXU matmuls (one per kernel row) on the stacked batch."""
        acc = None
        for dy in range(3):                                     # static, unrolled
            rows = pad_ref[pl.ds(dy, M), :].astype(jnp.bfloat16)      # (M, PWC)
            part = jnp.dot(rows, w_ref[dy],
                           preferred_element_type=jnp.float32)        # (M, WC)
            acc = part if acc is None else acc + part
        return acc                                              # (M, WC) f32

    # conv1 -> bn2 (scale folded into w1, bias added here) -> relu
    y = jnp.maximum(conv(w1_ref) + bias, 0.0)
    for n in range(Nps):                        # store only valid rows per image
        pad_ref[pl.ds(n * S + 1, H), pl.ds(0, WC)] = y[n * S:n * S + H]

    # conv2 from the same scratch (halo still zero) -> bn2 -> + identity -> relu
    y2 = conv(w2_ref) + bias
    for n in range(Nps):
        res = jnp.maximum(y2[n * S:n * S + H] + x_ref[n].astype(jnp.float32), 0.0)
        o_ref[n] = res.astype(o_ref.dtype)


# ------------------------------ wrappers --------------------------------------

def _expand_row_banded(w9_scaled, W):
    """(9, Cin, Cout) tap weights -> (3, (W+2)*Cin, W*Cout) row-banded weights
    matched to the lane-aligned padded layout [interior | left halo | right halo],
    so that  y[h, w*Cout+o] = sum_dy  P[h+dy, :] @ B[dy]."""
    _, Cin, Cout = w9_scaled.shape
    wk = w9_scaled.reshape(3, 3, Cin, Cout)                 # [dy, dx, i, o]
    eye = jnp.eye(W, dtype=w9_scaled.dtype)
    # First build in the "natural" padded order: column (w+dx)*Cin + i.
    B = jnp.zeros((3, (W + 2) * Cin, W * Cout), w9_scaled.dtype)
    for dx in range(3):
        blk = jnp.einsum('dio,wv->dwivo', wk[:, dx], eye)   # (3, W, Cin, W, Cout)
        blk = blk.reshape(3, W * Cin, W * Cout)
        B = B.at[:, dx * Cin: dx * Cin + W * Cin, :].add(blk)
    # Permute K rows to the lane-aligned layout: interior first, halos appended.
    interior = B[:, Cin:(W + 1) * Cin, :]
    left = B[:, :Cin, :]                                     # x position -1 (zero)
    right = B[:, (W + 1) * Cin:, :]                          # x position  W (zero)
    return jnp.concatenate([interior, left, right], axis=1)


def block_forward(x_nhwc, w1_9, w2_9, bn2_scale, bn2_bias, *, num_steps=1):
    """Pallas implementation of Block.forward (stride=1, i_downsample=None).
    x_nhwc: (N,H,W,C); w*_9: (9,Cin,Cout) taps (kh*kw, in, out).
    num_steps=1 is best on v5e/v6e; use num_steps=2 on v7x (one big step per TC)."""
    N, H, W, C = x_nhwc.shape
    Cout = w1_9.shape[-1]
    assert C == Cout, "identity add requires in_channels == out_channels"
    assert N % num_steps == 0
    Nps = N // num_steps
    WC = W * C
    PWC = WC + 2 * C

    # Fold BN scale into the conv weights (trace time), ship weights as bf16.
    w1b = _expand_row_banded(w1_9 * bn2_scale[None, None, :], W).astype(jnp.bfloat16)
    w2b = _expand_row_banded(w2_9 * bn2_scale[None, None, :], W).astype(jnp.bfloat16)
    bias = jnp.tile(bn2_bias, W)[None, :].astype(jnp.float32)   # (1, W*C)

    x_flat = x_nhwc.reshape(N, H, WC)                            # free reshape

    kernel = functools.partial(block_kernel, Nps=Nps, H=H, W=W, C=C)
    out = pl.pallas_call(
        kernel,
        out_shape=jax.ShapeDtypeStruct((N, H, WC), x_nhwc.dtype),
        grid=(num_steps,),
        in_specs=[
            pl.BlockSpec((Nps, H, WC), lambda s: (s, 0, 0)),     # x (identity)
            pl.BlockSpec((3, PWC, WC), lambda s: (0, 0, 0)),     # banded w1*scale
            pl.BlockSpec((3, PWC, WC), lambda s: (0, 0, 0)),     # banded w2*scale
            pl.BlockSpec((1, WC), lambda s: (0, 0)),             # bn2 bias (tiled)
        ],
        out_specs=pl.BlockSpec((Nps, H, WC), lambda s: (s, 0, 0)),
        scratch_shapes=[pltpu.VMEM((Nps * (H + 2), PWC), jnp.float32)],
        compiler_params=pltpu.CompilerParams(
            dimension_semantics=("parallel",)),
    )(x_flat, w1b, w2b, bias)
    return out.reshape(N, H, W, C)


# ----------------------------- pure-JAX reference -----------------------------

def _ref_conv(x, w_oihw):
    w_hwio = jnp.transpose(w_oihw, (2, 3, 1, 0))
    return jax.lax.conv_general_dilated(
        x, w_hwio, window_strides=(1, 1), padding="SAME",
        dimension_numbers=("NHWC", "HWIO", "NHWC"))


def block_forward_ref(x, w1_oihw, w2_oihw, scale, bias):
    identity = x
    y = jax.nn.relu(_ref_conv(x, w1_oihw) * scale + bias)
    y = _ref_conv(y, w2_oihw) * scale + bias
    return jax.nn.relu(y + identity)


# ------------------------------------ main ------------------------------------

if __name__ == "__main__":
    # Small shapes: W*C = 128 (one full lane tile), N*(H+2)-2 = 142 matmul rows.
    N, C, H, W = 8, 8, 16, 16          # in_channels == out_channels (no downsample)
    key = jax.random.PRNGKey(0)
    kx, kw1, kw2, kg, kb, km, kv = jax.random.split(key, 7)

    x_nchw = jax.random.normal(kx, (N, C, H, W), jnp.float32)
    x = jnp.transpose(x_nchw, (0, 2, 3, 1))                  # -> NHWC

    # Conv weights in PyTorch OIHW layout, deterministically initialized.
    w1_oihw = 0.1 * jax.random.normal(kw1, (C, C, 3, 3), jnp.float32)
    w2_oihw = 0.1 * jax.random.normal(kw2, (C, C, 3, 3), jnp.float32)
    # Repack to (kh*kw, Cin, Cout) taps for the kernel formulation.
    w1_9 = jnp.transpose(w1_oihw, (2, 3, 1, 0)).reshape(9, C, C)
    w2_9 = jnp.transpose(w2_oihw, (2, 3, 1, 0)).reshape(9, C, C)

    # batch_norm2 parameters (the module reuses batch_norm2 for both convs).
    gamma = 0.5 + jax.random.uniform(kg, (C,), jnp.float32)
    beta = 0.1 * jax.random.normal(kb, (C,), jnp.float32)
    run_mean = 0.1 * jax.random.normal(km, (C,), jnp.float32)
    run_var = 0.5 + jax.random.uniform(kv, (C,), jnp.float32)
    eps = 1e-5
    bn2_scale = gamma / jnp.sqrt(run_var + eps)
    bn2_bias = beta - run_mean * bn2_scale

    out = block_forward(x, w1_9, w2_9, bn2_scale, bn2_bias, num_steps=1)
    out = jax.block_until_ready(out)

    ref = block_forward_ref(x, w1_oihw, w2_oihw, bn2_scale, bn2_bias)
    assert out.shape == (N, H, W, C)
    # bf16 MXU operands: tolerance relaxed vs the pure-f32 reference.
    assert jnp.allclose(out, ref, atol=3e-2, rtol=3e-2), "mismatch vs JAX reference"

    print("KERNEL_OK")
</pallas_src>

<mosaic_0001>
module attributes {stable_mosaic.version = 11 : i64} {
  func.func @block_kernel(%arg0: i32, %arg1: memref<8x16x128xf32, #tpu.memory_space<vmem>>, %arg2: memref<3x144x128xbf16, #tpu.memory_space<vmem>>, %arg3: memref<3x144x128xbf16, #tpu.memory_space<vmem>>, %arg4: memref<1x128xf32, #tpu.memory_space<vmem>>, %arg5: memref<8x16x128xf32, #tpu.memory_space<vmem>>, %arg6: memref<144x144xf32, #tpu.memory_space<vmem>>) attributes {dimension_semantics = [#tpu.dimension_semantics<parallel>], iteration_bounds = array<i64: 1>, scalar_prefetch = 0 : i64, scratch_operands = 1 : i64, tpu.core_type = #tpu.core_type<tc>, window_params = [{transform_indices = @transform_0, window_bounds = array<i64: 8, 16, 128>}, {pipeline_mode = #tpu.pipeline_mode<synchronous>, transform_indices = @transform_1, window_bounds = array<i64: 3, 144, 128>}, {pipeline_mode = #tpu.pipeline_mode<synchronous>, transform_indices = @transform_2, window_bounds = array<i64: 3, 144, 128>}, {pipeline_mode = #tpu.pipeline_mode<synchronous>, transform_indices = @transform_3, window_bounds = array<i64: 1, 128>}, {transform_indices = @transform_4, window_bounds = array<i64: 8, 16, 128>}]} {
    %c0 = arith.constant 0 : index
    %c0_0 = arith.constant 0 : index
    %0 = vector.load %arg4[%c0, %c0_0] : memref<1x128xf32, #tpu.memory_space<vmem>>, vector<1x128xf32>
    %cst = arith.constant 0.000000e+00 : f32
    %1 = vector.broadcast %cst : f32 to vector<144x16xf32>
    %c0_1 = arith.constant 0 : index
    %c128 = arith.constant 128 : index
    %2 = vector.load %arg6[%c0_1, %c128] : memref<144x144xf32, #tpu.memory_space<vmem>>, vector<144x16xf32>
    tpu.vector_store %arg6[%c0_1, %c128], %1 {strides = array<i32>} : memref<144x144xf32, #tpu.memory_space<vmem>>, vector<144x16xf32>,
    %cst_2 = arith.constant 0.000000e+00 : f32
    %3 = vector.broadcast %cst_2 : f32 to vector<1x128xf32>
    %c0_3 = arith.constant 0 : index
    %c0_4 = arith.constant 0 : index
    %4 = vector.load %arg6[%c0_3, %c0_4] : memref<144x144xf32, #tpu.memory_space<vmem>>, vector<1x128xf32>
    tpu.vector_store %arg6[%c0_3, %c0_4], %3 {strides = array<i32>} : memref<144x144xf32, #tpu.memory_space<vmem>>, vector<1x128xf32>,
    %c17 = arith.constant 17 : index
    %c0_5 = arith.constant 0 : index
    %5 = vector.load %arg6[%c17, %c0_5] : memref<144x144xf32, #tpu.memory_space<vmem>>, vector<1x128xf32>
    tpu.vector_store %arg6[%c17, %c0_5], %3 {strides = array<i32>} : memref<144x144xf32, #tpu.memory_space<vmem>>, vector<1x128xf32>,
    %c18 = arith.constant 18 : index
    %c0_6 = arith.constant 0 : index
    %6 = vector.load %arg6[%c18, %c0_6] : memref<144x144xf32, #tpu.memory_space<vmem>>, vector<1x128xf32>
    tpu.vector_store %arg6[%c18, %c0_6], %3 {strides = array<i32>} : memref<144x144xf32, #tpu.memory_space<vmem>>, vector<1x128xf32>,
    %c35 = arith.constant 35 : index
    %c0_7 = arith.constant 0 : index
    %7 = vector.load %arg6[%c35, %c0_7] : memref<144x144xf32, #tpu.memory_space<vmem>>, vector<1x128xf32>
    tpu.vector_store %arg6[%c35, %c0_7], %3 {strides = array<i32>} : memref<144x144xf32, #tpu.memory_space<vmem>>, vector<1x128xf32>,
    %c36 = arith.constant 36 : index
    %c0_8 = arith.constant 0 : index
    %8 = vector.load %arg6[%c36, %c0_8] : memref<144x144xf32, #tpu.memory_space<vmem>>, vector<1x128xf32>
    tpu.vector_store %arg6[%c36, %c0_8], %3 {strides = array<i32>} : memref<144x144xf32, #tpu.memory_space<vmem>>, vector<1x128xf32>,
    %c53 = arith.constant 53 : index
    %c0_9 = arith.constant 0 : index
    %9 = vector.load %arg6[%c53, %c0_9] : memref<144x144xf32, #tpu.memory_space<vmem>>, vector<1x128xf32>
    tpu.vector_store %arg6[%c53, %c0_9], %3 {strides = array<i32>} : memref<144x144xf32, #tpu.memory_space<vmem>>, vector<1x128xf32>,
    %c54 = arith.constant 54 : index
    %c0_10 = arith.constant 0 : index
    %10 = vector.load %arg6[%c54, %c0_10] : memref<144x144xf32, #tpu.memory_space<vmem>>, vector<1x128xf32>
    tpu.vector_store %arg6[%c54, %c0_10], %3 {strides = array<i32>} : memref<144x144xf32, #tpu.memory_space<vmem>>, vector<1x128xf32>,
    %c71 = arith.constant 71 : index
    %c0_11 = arith.constant 0 : index
    %11 = vector.load %arg6[%c71, %c0_11] : memref<144x144xf32, #tpu.memory_space<vmem>>, vector<1x128xf32>
    tpu.vector_store %arg6[%c71, %c0_11], %3 {strides = array<i32>} : memref<144x144xf32, #tpu.memory_space<vmem>>, vector<1x128xf32>,
    %c72 = arith.constant 72 : index
    %c0_12 = arith.constant 0 : index
    %12 = vector.load %arg6[%c72, %c0_12] : memref<144x144xf32, #tpu.memory_space<vmem>>, vector<1x128xf32>
    tpu.vector_store %arg6[%c72, %c0_12], %3 {strides = array<i32>} : memref<144x144xf32, #tpu.memory_space<vmem>>, vector<1x128xf32>,
    %c89 = arith.constant 89 : index
    %c0_13 = arith.constant 0 : index
    %13 = vector.load %arg6[%c89, %c0_13] : memref<144x144xf32, #tpu.memory_space<vmem>>, vector<1x128xf32>
    tpu.vector_store %arg6[%c89, %c0_13], %3 {strides = array<i32>} : memref<144x144xf32, #tpu.memory_space<vmem>>, vector<1x128xf32>,
    %c90 = arith.constant 90 : index
    %c0_14 = arith.constant 0 : index
    %14 = vector.load %arg6[%c90, %c0_14] : memref<144x144xf32, #tpu.memory_space<vmem>>, vector<1x128xf32>
    tpu.vector_store %arg6[%c90, %c0_14], %3 {strides = array<i32>} : memref<144x144xf32, #tpu.memory_space<vmem>>, vector<1x128xf32>,
    %c107 = arith.constant 107 : index
    %c0_15 = arith.constant 0 : index
    %15 = vector.load %arg6[%c107, %c0_15] : memref<144x144xf32, #tpu.memory_space<vmem>>, vector<1x128xf32>
    tpu.vector_store %arg6[%c107, %c0_15], %3 {strides = array<i32>} : memref<144x144xf32, #tpu.memory_space<vmem>>, vector<1x128xf32>,
    %c108 = arith.constant 108 : index
    %c0_16 = arith.constant 0 : index
    %16 = vector.load %arg6[%c108, %c0_16] : memref<144x144xf32, #tpu.memory_space<vmem>>, vector<1x128xf32>
    tpu.vector_store %arg6[%c108, %c0_16], %3 {strides = array<i32>} : memref<144x144xf32, #tpu.memory_space<vmem>>, vector<1x128xf32>,
    %c125 = arith.constant 125 : index
    %c0_17 = arith.constant 0 : index
    %17 = vector.load %arg6[%c125, %c0_17] : memref<144x144xf32, #tpu.memory_space<vmem>>, vector<1x128xf32>
    tpu.vector_store %arg6[%c125, %c0_17], %3 {strides = array<i32>} : memref<144x144xf32, #tpu.memory_space<vmem>>, vector<1x128xf32>,
    %c126 = arith.constant 126 : index
    %c0_18 = arith.constant 0 : index
    %18 = vector.load %arg6[%c126, %c0_18] : memref<144x144xf32, #tpu.memory_space<vmem>>, vector<1x128xf32>
    tpu.vector_store %arg6[%c126, %c0_18], %3 {strides = array<i32>} : memref<144x144xf32, #tpu.memory_space<vmem>>, vector<1x128xf32>,
    %c143 = arith.constant 143 : index
    %c0_19 = arith.constant 0 : index
    %19 = vector.load %arg6[%c143, %c0_19] : memref<144x144xf32, #tpu.memory_space<vmem>>, vector<1x128xf32>
    tpu.vector_store %arg6[%c143, %c0_19], %3 {strides = array<i32>} : memref<144x144xf32, #tpu.memory_space<vmem>>, vector<1x128xf32>,
    %c0_20 = arith.constant 0 : index
    %c0_21 = arith.constant 0 : index
    %c0_22 = arith.constant 0 : index
    %20 = vector.load %arg1[%c0_20, %c0_21, %c0_22] : memref<8x16x128xf32, #tpu.memory_space<vmem>>, vector<1x16x128xf32>
    %21 = vector.shape_cast %20 : vector<1x16x128xf32> to vector<16x128xf32>
    %c1 = arith.constant 1 : index
    %c0_23 = arith.constant 0 : index
    %22 = vector.load %arg6[%c1, %c0_23] : memref<144x144xf32, #tpu.memory_space<vmem>>, vector<16x128xf32>
    tpu.vector_store %arg6[%c1, %c0_23], %21 {strides = array<i32>} : memref<144x144xf32, #tpu.memory_space<vmem>>, vector<16x128xf32>,
    %c1_24 = arith.constant 1 : index
    %c0_25 = arith.constant 0 : index
    %c0_26 = arith.constant 0 : index
    %23 = vector.load %arg1[%c1_24, %c0_25, %c0_26] : memref<8x16x128xf32, #tpu.memory_space<vmem>>, vector<1x16x128xf32>
    %24 = vector.shape_cast %23 : vector<1x16x128xf32> to vector<16x128xf32>
    %c19 = arith.constant 19 : index
    %c0_27 = arith.constant 0 : index
    %25 = vector.load %arg6[%c19, %c0_27] : memref<144x144xf32, #tpu.memory_space<vmem>>, vector<16x128xf32>
    tpu.vector_store %arg6[%c19, %c0_27], %24 {strides = array<i32>} : memref<144x144xf32, #tpu.memory_space<vmem>>, vector<16x128xf32>,
    %c2 = arith.constant 2 : index
    %c0_28 = arith.constant 0 : index
    %c0_29 = arith.constant 0 : index
    %26 = vector.load %arg1[%c2, %c0_28, %c0_29] : memref<8x16x128xf32, #tpu.memory_space<vmem>>, vector<1x16x128xf32>
    %27 = vector.shape_cast %26 : vector<1x16x128xf32> to vector<16x128xf32>
    %c37 = arith.constant 37 : index
    %c0_30 = arith.constant 0 : index
    %28 = vector.load %arg6[%c37, %c0_30] : memref<144x144xf32, #tpu.memory_space<vmem>>, vector<16x128xf32>
    tpu.vector_store %arg6[%c37, %c0_30], %27 {strides = array<i32>} : memref<144x144xf32, #tpu.memory_space<vmem>>, vector<16x128xf32>,
    %c3 = arith.constant 3 : index
    %c0_31 = arith.constant 0 : index
    %c0_32 = arith.constant 0 : index
    %29 = vector.load %arg1[%c3, %c0_31, %c0_32] : memref<8x16x128xf32, #tpu.memory_space<vmem>>, vector<1x16x128xf32>
    %30 = vector.shape_cast %29 : vector<1x16x128xf32> to vector<16x128xf32>
    %c55 = arith.constant 55 : index
    %c0_33 = arith.constant 0 : index
    %31 = vector.load %arg6[%c55, %c0_33] : memref<144x144xf32, #tpu.memory_space<vmem>>, vector<16x128xf32>
    tpu.vector_store %arg6[%c55, %c0_33], %30 {strides = array<i32>} : memref<144x144xf32, #tpu.memory_space<vmem>>, vector<16x128xf32>,
    %c4 = arith.constant 4 : index
    %c0_34 = arith.constant 0 : index
    %c0_35 = arith.constant 0 : index
    %32 = vector.load %arg1[%c4, %c0_34, %c0_35] : memref<8x16x128xf32, #tpu.memory_space<vmem>>, vector<1x16x128xf32>
    %33 = vector.shape_cast %32 : vector<1x16x128xf32> to vector<16x128xf32>
    %c73 = arith.constant 73 : index
    %c0_36 = arith.constant 0 : index
    %34 = vector.load %arg6[%c73, %c0_36] : memref<144x144xf32, #tpu.memory_space<vmem>>, vector<16x128xf32>
    tpu.vector_store %arg6[%c73, %c0_36], %33 {strides = array<i32>} : memref<144x144xf32, #tpu.memory_space<vmem>>, vector<16x128xf32>,
    %c5 = arith.constant 5 : index
    %c0_37 = arith.constant 0 : index
    %c0_38 = arith.constant 0 : index
    %35 = vector.load %arg1[%c5, %c0_37, %c0_38] : memref<8x16x128xf32, #tpu.memory_space<vmem>>, vector<1x16x128xf32>
    %36 = vector.shape_cast %35 : vector<1x16x128xf32> to vector<16x128xf32>
    %c91 = arith.constant 91 : index
    %c0_39 = arith.constant 0 : index
    %37 = vector.load %arg6[%c91, %c0_39] : memref<144x144xf32, #tpu.memory_space<vmem>>, vector<16x128xf32>
    tpu.vector_store %arg6[%c91, %c0_39], %36 {strides = array<i32>} : memref<144x144xf32, #tpu.memory_space<vmem>>, vector<16x128xf32>,
    %c6 = arith.constant 6 : index
    %c0_40 = arith.constant 0 : index
    %c0_41 = arith.constant 0 : index
    %38 = vector.load %arg1[%c6, %c0_40, %c0_41] : memref<8x16x128xf32, #tpu.memory_space<vmem>>, vector<1x16x128xf32>
    %39 = vector.shape_cast %38 : vector<1x16x128xf32> to vector<16x128xf32>
    %c109 = arith.constant 109 : index
    %c0_42 = arith.constant 0 : index
    %40 = vector.load %arg6[%c109, %c0_42] : memref<144x144xf32, #tpu.memory_space<vmem>>, vector<16x128xf32>
    tpu.vector_store %arg6[%c109, %c0_42], %39 {strides = array<i32>} : memref<144x144xf32, #tpu.memory_space<vmem>>, vector<16x128xf32>,
    %c7 = arith.constant 7 : index
    %c0_43 = arith.constant 0 : index
    %c0_44 = arith.constant 0 : index
    %41 = vector.load %arg1[%c7, %c0_43, %c0_44] : memref<8x16x128xf32, #tpu.memory_space<vmem>>, vector<1x16x128xf32>
    %42 = vector.shape_cast %41 : vector<1x16x128xf32> to vector<16x128xf32>
    %c127 = arith.constant 127 : index
    %c0_45 = arith.constant 0 : index
    %43 = vector.load %arg6[%c127, %c0_45] : memref<144x144xf32, #tpu.memory_space<vmem>>, vector<16x128xf32>
    tpu.vector_store %arg6[%c127, %c0_45], %42 {strides = array<i32>} : memref<144x144xf32, #tpu.memory_space<vmem>>, vector<16x128xf32>,
    %c0_46 = arith.constant 0 : index
    %c0_47 = arith.constant 0 : index
    %44 = vector.load %arg6[%c0_46, %c0_47] : memref<144x144xf32, #tpu.memory_space<vmem>>, vector<142x144xf32>
    %45 = arith.truncf %44 : vector<142x144xf32> to vector<142x144xbf16>
    %c0_48 = arith.constant 0 : index
    %c0_49 = arith.constant 0 : index
    %c0_50 = arith.constant 0 : index
    %46 = vector.load %arg2[%c0_48, %c0_49, %c0_50] : memref<3x144x128xbf16, #tpu.memory_space<vmem>>, vector<1x144x128xbf16>
    %47 = vector.shape_cast %46 : vector<1x144x128xbf16> to vector<144x128xbf16>
    %cst_51 = arith.constant dense<0.000000e+00> : vector<142x128xf32>
    %48 = tpu.matmul %45, %47, %cst_51 {dimension_numbers = #tpu.dot_dimension_numbers<[1], [0], [0], [1], [0, 0, 1, 1], [], []>} : vector<142x144xbf16>, vector<144x128xbf16>, vector<142x128xf32> -> vector<142x128xf32>
    %c1_52 = arith.constant 1 : index
    %c0_53 = arith.constant 0 : index
    %49 = vector.load %arg6[%c1_52, %c0_53] : memref<144x144xf32, #tpu.memory_space<vmem>>, vector<142x144xf32>
    %50 = arith.truncf %49 : vector<142x144xf32> to vector<142x144xbf16>
    %c1_54 = arith.constant 1 : index
    %c0_55 = arith.constant 0 : index
    %c0_56 = arith.constant 0 : index
    %51 = vector.load %arg2[%c1_54, %c0_55, %c0_56] : memref<3x144x128xbf16, #tpu.memory_space<vmem>>, vector<1x144x128xbf16>
    %52 = vector.shape_cast %51 : vector<1x144x128xbf16> to vector<144x128xbf16>
    %cst_57 = arith.constant dense<0.000000e+00> : vector<142x128xf32>
    %53 = tpu.matmul %50, %52, %cst_57 {dimension_numbers = #tpu.dot_dimension_numbers<[1], [0], [0], [1], [0, 0, 1, 1], [], []>} : vector<142x144xbf16>, vector<144x128xbf16>, vector<142x128xf32> -> vector<142x128xf32>
    %54 = arith.addf %48, %53 : vector<142x128xf32>
    %c2_58 = arith.constant 2 : index
    %c0_59 = arith.constant 0 : index
    %55 = vector.load %arg6[%c2_58, %c0_59] : memref<144x144xf32, #tpu.memory_space<vmem>>, vector<142x144xf32>
    %56 = arith.truncf %55 : vector<142x144xf32> to vector<142x144xbf16>
    %c2_60 = arith.constant 2 : index
    %c0_61 = arith.constant 0 : index
    %c0_62 = arith.constant 0 : index
    %57 = vector.load %arg2[%c2_60, %c0_61, %c0_62] : memref<3x144x128xbf16, #tpu.memory_space<vmem>>, vector<1x144x128xbf16>
    %58 = vector.shape_cast %57 : vector<1x144x128xbf16> to vector<144x128xbf16>
    %cst_63 = arith.constant dense<0.000000e+00> : vector<142x128xf32>
    %59 = tpu.matmul %56, %58, %cst_63 {dimension_numbers = #tpu.dot_dimension_numbers<[1], [0], [0], [1], [0, 0, 1, 1], [], []>} : vector<142x144xbf16>, vector<144x128xbf16>, vector<142x128xf32> -> vector<142x128xf32>
    %60 = arith.addf %54, %59 : vector<142x128xf32>
    %61 = vector.broadcast %0 : vector<1x128xf32> to vector<142x128xf32>
    %62 = arith.addf %60, %61 : vector<142x128xf32>
    %cst_64 = arith.constant 0.000000e+00 : f32
    %63 = vector.broadcast %cst_64 : f32 to vector<142x128xf32>
    %64 = arith.maximumf %62, %63 : vector<142x128xf32>
    %65 = vector.extract_strided_slice %64 {offsets = [0, 0], sizes = [16, 128], strides = [1, 1]} : vector<142x128xf32> to vector<16x128xf32>
    %c1_65 = arith.constant 1 : index
    %c0_66 = arith.constant 0 : index
    %66 = vector.load %arg6[%c1_65, %c0_66] : memref<144x144xf32, #tpu.memory_space<vmem>>, vector<16x128xf32>
    tpu.vector_store %arg6[%c1_65, %c0_66], %65 {strides = array<i32>} : memref<144x144xf32, #tpu.memory_space<vmem>>, vector<16x128xf32>,
    %67 = vector.extract_strided_slice %64 {offsets = [18, 0], sizes = [16, 128], strides = [1, 1]} : vector<142x128xf32> to vector<16x128xf32>
    %c19_67 = arith.constant 19 : index
    %c0_68 = arith.constant 0 : index
    %68 = vector.load %arg6[%c19_67, %c0_68] : memref<144x144xf32, #tpu.memory_space<vmem>>, vector<16x128xf32>
    tpu.vector_store %arg6[%c19_67, %c0_68], %67 {strides = array<i32>} : memref<144x144xf32, #tpu.memory_space<vmem>>, vector<16x128xf32>,
    %69 = vector.extract_strided_slice %64 {offsets = [36, 0], sizes = [16, 128], strides = [1, 1]} : vector<142x128xf32> to vector<16x128xf32>
    %c37_69 = arith.constant 37 : index
    %c0_70 = arith.constant 0 : index
    %70 = vector.load %arg6[%c37_69, %c0_70] : memref<144x144xf32, #tpu.memory_space<vmem>>, vector<16x128xf32>
    tpu.vector_store %arg6[%c37_69, %c0_70], %69 {strides = array<i32>} : memref<144x144xf32, #tpu.memory_space<vmem>>, vector<16x128xf32>,
    %71 = vector.extract_strided_slice %64 {offsets = [54, 0], sizes = [16, 128], strides = [1, 1]} : vector<142x128xf32> to vector<16x128xf32>
    %c55_71 = arith.constant 55 : index
    %c0_72 = arith.constant 0 : index
    %72 = vector.load %arg6[%c55_71, %c0_72] : memref<144x144xf32, #tpu.memory_space<vmem>>, vector<16x128xf32>
    tpu.vector_store %arg6[%c55_71, %c0_72], %71 {strides = array<i32>} : memref<144x144xf32, #tpu.memory_space<vmem>>, vector<16x128xf32>,
    %73 = vector.extract_strided_slice %64 {offsets = [72, 0], sizes = [16, 128], strides = [1, 1]} : vector<142x128xf32> to vector<16x128xf32>
    %c73_73 = arith.constant 73 : index
    %c0_74 = arith.constant 0 : index
    %74 = vector.load %arg6[%c73_73, %c0_74] : memref<144x144xf32, #tpu.memory_space<vmem>>, vector<16x128xf32>
    tpu.vector_store %arg6[%c73_73, %c0_74], %73 {strides = array<i32>} : memref<144x144xf32, #tpu.memory_space<vmem>>, vector<16x128xf32>,
    %75 = vector.extract_strided_slice %64 {offsets = [90, 0], sizes = [16, 128], strides = [1, 1]} : vector<142x128xf32> to vector<16x128xf32>
    %c91_75 = arith.constant 91 : index
    %c0_76 = arith.constant 0 : index
    %76 = vector.load %arg6[%c91_75, %c0_76] : memref<144x144xf32, #tpu.memory_space<vmem>>, vector<16x128xf32>
    tpu.vector_store %arg6[%c91_75, %c0_76], %75 {strides = array<i32>} : memref<144x144xf32, #tpu.memory_space<vmem>>, vector<16x128xf32>,
    %77 = vector.extract_strided_slice %64 {offsets = [108, 0], sizes = [16, 128], strides = [1, 1]} : vector<142x128xf32> to vector<16x128xf32>
    %c109_77 = arith.constant 109 : index
    %c0_78 = arith.constant 0 : index
    %78 = vector.load %arg6[%c109_77, %c0_78] : memref<144x144xf32, #tpu.memory_space<vmem>>, vector<16x128xf32>
    tpu.vector_store %arg6[%c109_77, %c0_78], %77 {strides = array<i32>} : memref<144x144xf32, #tpu.memory_space<vmem>>, vector<16x128xf32>,
    %79 = vector.extract_strided_slice %64 {offsets = [126, 0], sizes = [16, 128], strides = [1, 1]} : vector<142x128xf32> to vector<16x128xf32>
    %c127_79 = arith.constant 127 : index
    %c0_80 = arith.constant 0 : index
    %80 = vector.load %arg6[%c127_79, %c0_80] : memref<144x144xf32, #tpu.memory_space<vmem>>, vector<16x128xf32>
    tpu.vector_store %arg6[%c127_79, %c0_80], %79 {strides = array<i32>} : memref<144x144xf32, #tpu.memory_space<vmem>>, vector<16x128xf32>,
    %c0_81 = arith.constant 0 : index
    %c0_82 = arith.constant 0 : index
    %81 = vector.load %arg6[%c0_81, %c0_82] : memref<144x144xf32, #tpu.memory_space<vmem>>, vector<142x144xf32>
    %82 = arith.truncf %81 : vector<142x144xf32> to vector<142x144xbf16>
    %c0_83 = arith.constant 0 : index
    %c0_84 = arith.constant 0 : index
    %c0_85 = arith.constant 0 : index
    %83 = vector.load %arg3[%c0_83, %c0_84, %c0_85] : memref<3x144x128xbf16, #tpu.memory_space<vmem>>, vector<1x144x128xbf16>
    %84 = vector.shape_cast %83 : vector<1x144x128xbf16> to vector<144x128xbf16>
    %cst_86 = arith.constant dense<0.000000e+00> : vector<142x128xf32>
    %85 = tpu.matmul %82, %84, %cst_86 {dimension_numbers = #tpu.dot_dimension_numbers<[1], [0], [0], [1], [0, 0, 1, 1], [], []>} : vector<142x144xbf16>, vector<144x128xbf16>, vector<142x128xf32> -> vector<142x128xf32>
    %c1_87 = arith.constant 1 : index
    %c0_88 = arith.constant 0 : index
    %86 = vector.load %arg6[%c1_87, %c0_88] : memref<144x144xf32, #tpu.memory_space<vmem>>, vector<142x144xf32>
    %87 = arith.truncf %86 : vector<142x144xf32> to vector<142x144xbf16>
    %c1_89 = arith.constant 1 : index
    %c0_90 = arith.constant 0 : index
    %c0_91 = arith.constant 0 : index
    %88 = vector.load %arg3[%c1_89, %c0_90, %c0_91] : memref<3x144x128xbf16, #tpu.memory_space<vmem>>, vector<1x144x128xbf16>
    %89 = vector.shape_cast %88 : vector<1x144x128xbf16> to vector<144x128xbf16>
    %cst_92 = arith.constant dense<0.000000e+00> : vector<142x128xf32>
    %90 = tpu.matmul %87, %89, %cst_92 {dimension_numbers = #tpu.dot_dimension_numbers<[1], [0], [0], [1], [0, 0, 1, 1], [], []>} : vector<142x144xbf16>, vector<144x128xbf16>, vector<142x128xf32> -> vector<142x128xf32>
    %91 = arith.addf %85, %90 : vector<142x128xf32>
    %c2_93 = arith.constant 2 : index
    %c0_94 = arith.constant 0 : index
    %92 = vector.load %arg6[%c2_93, %c0_94] : memref<144x144xf32, #tpu.memory_space<vmem>>, vector<142x144xf32>
    %93 = arith.truncf %92 : vector<142x144xf32> to vector<142x144xbf16>
    %c2_95 = arith.constant 2 : index
    %c0_96 = arith.constant 0 : index
    %c0_97 = arith.constant 0 : index
    %94 = vector.load %arg3[%c2_95, %c0_96, %c0_97] : memref<3x144x128xbf16, #tpu.memory_space<vmem>>, vector<1x144x128xbf16>
    %95 = vector.shape_cast %94 : vector<1x144x128xbf16> to vector<144x128xbf16>
    %cst_98 = arith.constant dense<0.000000e+00> : vector<142x128xf32>
    %96 = tpu.matmul %93, %95, %cst_98 {dimension_numbers = #tpu.dot_dimension_numbers<[1], [0], [0], [1], [0, 0, 1, 1], [], []>} : vector<142x144xbf16>, vector<144x128xbf16>, vector<142x128xf32> -> vector<142x128xf32>
    %97 = arith.addf %91, %96 : vector<142x128xf32>
    %98 = vector.broadcast %0 : vector<1x128xf32> to vector<142x128xf32>
    %99 = arith.addf %97, %98 : vector<142x128xf32>
    %100 = vector.extract_strided_slice %99 {offsets = [0, 0], sizes = [16, 128], strides = [1, 1]} : vector<142x128xf32> to vector<16x128xf32>
    %c0_99 = arith.constant 0 : index
    %c0_100 = arith.constant 0 : index
    %c0_101 = arith.constant 0 : index
    %101 = vector.load %arg1[%c0_99, %c0_100, %c0_101] : memref<8x16x128xf32, #tpu.memory_space<vmem>>, vector<1x16x128xf32>
    %102 = vector.shape_cast %101 : vector<1x16x128xf32> to vector<16x128xf32>
    %103 = arith.addf %100, %102 : vector<16x128xf32>
    %cst_102 = arith.constant 0.000000e+00 : f32
    %104 = vector.broadcast %cst_102 : f32 to vector<16x128xf32>
    %105 = arith.maximumf %103, %104 : vector<16x128xf32>
    %c0_103 = arith.constant 0 : index
    %c0_104 = arith.constant 0 : index
    %c0_105 = arith.constant 0 : index
    %106 = vector.load %arg5[%c0_103, %c0_104, %c0_105] : memref<8x16x128xf32, #tpu.memory_space<vmem>>, vector<1x16x128xf32>
    %107 = vector.shape_cast %106 : vector<1x16x128xf32> to vector<16x128xf32>
    %108 = vector.shape_cast %105 : vector<16x128xf32> to vector<1x16x128xf32>
    tpu.vector_store %arg5[%c0_103, %c0_104, %c0_105], %108 {strides = array<i32>} : memref<8x16x128xf32, #tpu.memory_space<vmem>>, vector<1x16x128xf32>,
    %109 = vector.extract_strided_slice %99 {offsets = [18, 0], sizes = [16, 128], strides = [1, 1]} : vector<142x128xf32> to vector<16x128xf32>
    %c1_106 = arith.constant 1 : index
    %c0_107 = arith.constant 0 : index
    %c0_108 = arith.constant 0 : index
    %110 = vector.load %arg1[%c1_106, %c0_107, %c0_108] : memref<8x16x128xf32, #tpu.memory_space<vmem>>, vector<1x16x128xf32>
    %111 = vector.shape_cast %110 : vector<1x16x128xf32> to vector<16x128xf32>
    %112 = arith.addf %109, %111 : vector<16x128xf32>
    %cst_109 = arith.constant 0.000000e+00 : f32
    %113 = vector.broadcast %cst_109 : f32 to vector<16x128xf32>
    %114 = arith.maximumf %112, %113 : vector<16x128xf32>
    %c1_110 = arith.constant 1 : index
    %c0_111 = arith.constant 0 : index
    %c0_112 = arith.constant 0 : index
    %115 = vector.load %arg5[%c1_110, %c0_111, %c0_112] : memref<8x16x128xf32, #tpu.memory_space<vmem>>, vector<1x16x128xf32>
    %116 = vector.shape_cast %115 : vector<1x16x128xf32> to vector<16x128xf32>
    %117 = vector.shape_cast %114 : vector<16x128xf32> to vector<1x16x128xf32>
    tpu.vector_store %arg5[%c1_110, %c0_111, %c0_112], %117 {strides = array<i32>} : memref<8x16x128xf32, #tpu.memory_space<vmem>>, vector<1x16x128xf32>,
    %118 = vector.extract_strided_slice %99 {offsets = [36, 0], sizes = [16, 128], strides = [1, 1]} : vector<142x128xf32> to vector<16x128xf32>
    %c2_113 = arith.constant 2 : index
    %c0_114 = arith.constant 0 : index
    %c0_115 = arith.constant 0 : index
    %119 = vector.load %arg1[%c2_113, %c0_114, %c0_115] : memref<8x16x128xf32, #tpu.memory_space<vmem>>, vector<1x16x128xf32>
    %120 = vector.shape_cast %119 : vector<1x16x128xf32> to vector<16x128xf32>
    %121 = arith.addf %118, %120 : vector<16x128xf32>
    %cst_116 = arith.constant 0.000000e+00 : f32
    %122 = vector.broadcast %cst_116 : f32 to vector<16x128xf32>
    %123 = arith.maximumf %121, %122 : vector<16x128xf32>
    %c2_117 = arith.constant 2 : index
    %c0_118 = arith.constant 0 : index
    %c0_119 = arith.constant 0 : index
    %124 = vector.load %arg5[%c2_117, %c0_118, %c0_119] : memref<8x16x128xf32, #tpu.memory_space<vmem>>, vector<1x16x128xf32>
    %125 = vector.shape_cast %124 : vector<1x16x128xf32> to vector<16x128xf32>
    %126 = vector.shape_cast %123 : vector<16x128xf32> to vector<1x16x128xf32>
    tpu.vector_store %arg5[%c2_117, %c0_118, %c0_119], %126 {strides = array<i32>} : memref<8x16x128xf32, #tpu.memory_space<vmem>>, vector<1x16x128xf32>,
    %127 = vector.extract_strided_slice %99 {offsets = [54, 0], sizes = [16, 128], strides = [1, 1]} : vector<142x128xf32> to vector<16x128xf32>
    %c3_120 = arith.constant 3 : index
    %c0_121 = arith.constant 0 : index
    %c0_122 = arith.constant 0 : index
    %128 = vector.load %arg1[%c3_120, %c0_121, %c0_122] : memref<8x16x128xf32, #tpu.memory_space<vmem>>, vector<1x16x128xf32>
    %129 = vector.shape_cast %128 : vector<1x16x128xf32> to vector<16x128xf32>
    %130 = arith.addf %127, %129 : vector<16x128xf32>
    %cst_123 = arith.constant 0.000000e+00 : f32
    %131 = vector.broadcast %cst_123 : f32 to vector<16x128xf32>
    %132 = arith.maximumf %130, %131 : vector<16x128xf32>
    %c3_124 = arith.constant 3 : index
    %c0_125 = arith.constant 0 : index
    %c0_126 = arith.constant 0 : index
    %133 = vector.load %arg5[%c3_124, %c0_125, %c0_126] : memref<8x16x128xf32, #tpu.memory_space<vmem>>, vector<1x16x128xf32>
    %134 = vector.shape_cast %133 : vector<1x16x128xf32> to vector<16x128xf32>
    %135 = vector.shape_cast %132 : vector<16x128xf32> to vector<1x16x128xf32>
    tpu.vector_store %arg5[%c3_124, %c0_125, %c0_126], %135 {strides = array<i32>} : memref<8x16x128xf32, #tpu.memory_space<vmem>>, vector<1x16x128xf32>,
    %136 = vector.extract_strided_slice %99 {offsets = [72, 0], sizes = [16, 128], strides = [1, 1]} : vector<142x128xf32> to vector<16x128xf32>
    %c4_127 = arith.constant 4 : index
    %c0_128 = arith.constant 0 : index
    %c0_129 = arith.constant 0 : index
    %137 = vector.load %arg1[%c4_127, %c0_128, %c0_129] : memref<8x16x128xf32, #tpu.memory_space<vmem>>, vector<1x16x128xf32>
    %138 = vector.shape_cast %137 : vector<1x16x128xf32> to vector<16x128xf32>
    %139 = arith.addf %136, %138 : vector<16x128xf32>
    %cst_130 = arith.constant 0.000000e+00 : f32
    %140 = vector.broadcast %cst_130 : f32 to vector<16x128xf32>
    %141 = arith.maximumf %139, %140 : vector<16x128xf32>
    %c4_131 = arith.constant 4 : index
    %c0_132 = arith.constant 0 : index
    %c0_133 = arith.constant 0 : index
    %142 = vector.load %arg5[%c4_131, %c0_132, %c0_133] : memref<8x16x128xf32, #tpu.memory_space<vmem>>, vector<1x16x128xf32>
    %143 = vector.shape_cast %142 : vector<1x16x128xf32> to vector<16x128xf32>
    %144 = vector.shape_cast %141 : vector<16x128xf32> to vector<1x16x128xf32>
    tpu.vector_store %arg5[%c4_131, %c0_132, %c0_133], %144 {strides = array<i32>} : memref<8x16x128xf32, #tpu.memory_space<vmem>>, vector<1x16x128xf32>,
    %145 = vector.extract_strided_slice %99 {offsets = [90, 0], sizes = [16, 128], strides = [1, 1]} : vector<142x128xf32> to vector<16x128xf32>
    %c5_134 = arith.constant 5 : index
    %c0_135 = arith.constant 0 : index
    %c0_136 = arith.constant 0 : index
    %146 = vector.load %arg1[%c5_134, %c0_135, %c0_136] : memref<8x16x128xf32, #tpu.memory_space<vmem>>, vector<1x16x128xf32>
    %147 = vector.shape_cast %146 : vector<1x16x128xf32> to vector<16x128xf32>
    %148 = arith.addf %145, %147 : vector<16x128xf32>
    %cst_137 = arith.constant 0.000000e+00 : f32
    %149 = vector.broadcast %cst_137 : f32 to vector<16x128xf32>
    %150 = arith.maximumf %148, %149 : vector<16x128xf32>
    %c5_138 = arith.constant 5 : index
    %c0_139 = arith.constant 0 : index
    %c0_140 = arith.constant 0 : index
    %151 = vector.load %arg5[%c5_138, %c0_139, %c0_140] : memref<8x16x128xf32, #tpu.memory_space<vmem>>, vector<1x16x128xf32>
    %152 = vector.shape_cast %151 : vector<1x16x128xf32> to vector<16x128xf32>
    %153 = vector.shape_cast %150 : vector<16x128xf32> to vector<1x16x128xf32>
    tpu.vector_store %arg5[%c5_138, %c0_139, %c0_140], %153 {strides = array<i32>} : memref<8x16x128xf32, #tpu.memory_space<vmem>>, vector<1x16x128xf32>,
    %154 = vector.extract_strided_slice %99 {offsets = [108, 0], sizes = [16, 128], strides = [1, 1]} : vector<142x128xf32> to vector<16x128xf32>
    %c6_141 = arith.constant 6 : index
    %c0_142 = arith.constant 0 : index
    %c0_143 = arith.constant 0 : index
    %155 = vector.load %arg1[%c6_141, %c0_142, %c0_143] : memref<8x16x128xf32, #tpu.memory_space<vmem>>, vector<1x16x128xf32>
    %156 = vector.shape_cast %155 : vector<1x16x128xf32> to vector<16x128xf32>
    %157 = arith.addf %154, %156 : vector<16x128xf32>
    %cst_144 = arith.constant 0.000000e+00 : f32
    %158 = vector.broadcast %cst_144 : f32 to vector<16x128xf32>
    %159 = arith.maximumf %157, %158 : vector<16x128xf32>
    %c6_145 = arith.constant 6 : index
    %c0_146 = arith.constant 0 : index
    %c0_147 = arith.constant 0 : index
    %160 = vector.load %arg5[%c6_145, %c0_146, %c0_147] : memref<8x16x128xf32, #tpu.memory_space<vmem>>, vector<1x16x128xf32>
    %161 = vector.shape_cast %160 : vector<1x16x128xf32> to vector<16x128xf32>
    %162 = vector.shape_cast %159 : vector<16x128xf32> to vector<1x16x128xf32>
    tpu.vector_store %arg5[%c6_145, %c0_146, %c0_147], %162 {strides = array<i32>} : memref<8x16x128xf32, #tpu.memory_space<vmem>>, vector<1x16x128xf32>,
    %163 = vector.extract_strided_slice %99 {offsets = [126, 0], sizes = [16, 128], strides = [1, 1]} : vector<142x128xf32> to vector<16x128xf32>
    %c7_148 = arith.constant 7 : index
    %c0_149 = arith.constant 0 : index
    %c0_150 = arith.constant 0 : index
    %164 = vector.load %arg1[%c7_148, %c0_149, %c0_150] : memref<8x16x128xf32, #tpu.memory_space<vmem>>, vector<1x16x128xf32>
    %165 = vector.shape_cast %164 : vector<1x16x128xf32> to vector<16x128xf32>
    %166 = arith.addf %163, %165 : vector<16x128xf32>
    %cst_151 = arith.constant 0.000000e+00 : f32
    %167 = vector.broadcast %cst_151 : f32 to vector<16x128xf32>
    %168 = arith.maximumf %166, %167 : vector<16x128xf32>
    %c7_152 = arith.constant 7 : index
    %c0_153 = arith.constant 0 : index
    %c0_154 = arith.constant 0 : index
    %169 = vector.load %arg5[%c7_152, %c0_153, %c0_154] : memref<8x16x128xf32, #tpu.memory_space<vmem>>, vector<1x16x128xf32>
    %170 = vector.shape_cast %169 : vector<1x16x128xf32> to vector<16x128xf32>
    %171 = vector.shape_cast %168 : vector<16x128xf32> to vector<1x16x128xf32>
    tpu.vector_store %arg5[%c7_152, %c0_153, %c0_154], %171 {strides = array<i32>} : memref<8x16x128xf32, #tpu.memory_space<vmem>>, vector<1x16x128xf32>,
    return
  }
  func.func @transform_0(%arg0: i32) -> (i32, i32, i32) {
    %c0_i32 = arith.constant 0 : i32
    %c0_i32_0 = arith.constant 0 : i32
    %c0_i32_1 = arith.constant 0 : i32
    return %arg0, %c0_i32, %c0_i32_0 : i32, i32, i32
  }
  func.func @transform_1(%arg0: i32) -> (i32, i32, i32) {
    %c0_i32 = arith.constant 0 : i32
    %c0_i32_0 = arith.constant 0 : i32
    %c0_i32_1 = arith.constant 0 : i32
    %c0_i32_2 = arith.constant 0 : i32
    return %c0_i32, %c0_i32_0, %c0_i32_1 : i32, i32, i32
  }
  func.func @transform_2(%arg0: i32) -> (i32, i32, i32) {
    %c0_i32 = arith.constant 0 : i32
    %c0_i32_0 = arith.constant 0 : i32
    %c0_i32_1 = arith.constant 0 : i32
    %c0_i32_2 = arith.constant 0 : i32
    return %c0_i32, %c0_i32_0, %c0_i32_1 : i32, i32, i32
  }
  func.func @transform_3(%arg0: i32) -> (i32, i32) {
    %c0_i32 = arith.constant 0 : i32
    %c0_i32_0 = arith.constant 0 : i32
    %c0_i32_1 = arith.constant 0 : i32
    return %c0_i32, %c0_i32_0 : i32, i32
  }
  func.func @transform_4(%arg0: i32) -> (i32, i32, i32) {
    %c0_i32 = arith.constant 0 : i32
    %c0_i32_0 = arith.constant 0 : i32
    %c0_i32_1 = arith.constant 0 : i32
    return %arg0, %c0_i32, %c0_i32_0 : i32, i32, i32
  }
}

</mosaic_0001>

<bundles_post_ra>
// kernel: tpu_custom_call.1
= control target key start
LH: loop header
LB: loop body
LE: loop exit
PB: predicated region body
PF: predicated region fallthrough
CT: control target
= control target key end

     0   :  { %9 = vsyncpa [#allocation4], 0  ;;  %s3378_s0 = inlined_call_operand.hbm [shape: f32[8,16,128], index: 0, kind: input, shape index: {}]   ;;  %s3379_s1 = inlined_call_operand.hbm [shape: bf16[3,144,128], index: 1, kind: input, shape index: {}]   ;;  %s3380_s2 = inlined_call_operand.hbm [shape: bf16[3,144,128], index: 2, kind: input, shape index: {}]   ;;  %s3381_s3 = inlined_call_operand.vmem [shape: f32[1,128], index: 3, kind: input, shape index: {}]   ;;  %s3382_s4 = inlined_call_operand.hbm [shape: f32[8,16,128], index: 4, kind: output, shape index: {}]  }
   0x1   :  { %10 = vsyncpa [#allocation7], 0 }
   0x2   :  { %11 = vsyncpa [#allocation5], 0  ;;  %s2603_s15 = smov [#allocation6]  }
   0x3   :  { %s29_s16 = sshll.u32 %s2603_s15, 4  ;;  %s30_s16 = int_to_ptr.vmem [resolvable:$true] %s29_s16 }
   0x4   :  { %s2525_s17 = scalar_lea.vmem %s30_s16, 3456  ;;  %p2530_p1 = scmp.lt.s32.totalorder %s30_s16, %s30_s16 }
   0x5   :  { %p2526_p0 = scmp.ne.s32.totalorder %s30_s16, %s2525_s17  ;;  %p2531_p2 = scmp.lt.s32.totalorder %s2525_s17, %s2525_s17 }
   0x7   :  { %p2532_p3 = por %p2531_p2, %p2530_p1 }
   0x9   :  { %p2533_p4 = pnand %p2532_p3, %p2526_p0 }
   0xb   :  { %2536 = shalt.err (!%p2533_p4)
}
   0xc   :  { %s2604_s18 = smov 64   ;;  %s2605_s19 = smov 4  }
   0xd   :  { %35 = dma.hbm_to_vmem [thread:$0]  %s3379_s1, 3456, %s30_s16, [#allocation7], %s2604_s18, %s2604_s18, %s2605_s19  }
   0xe   :  { %s2606_s22 = smov [#allocation3]  }
   0xf   :  { %s17_s23 = sshll.u32 %s2606_s22, 4  ;;  %s18_s23 = int_to_ptr.vmem [resolvable:$true] %s17_s23 }
  0x10   :  { %s2545_s24 = scalar_lea.vmem %s18_s23, 2048  ;;  %p2550_p6 = scmp.lt.s32.totalorder %s18_s23, %s18_s23 }
  0x11   :  { %p2546_p5 = scmp.ne.s32.totalorder %s18_s23, %s2545_s24  ;;  %p2551_p7 = scmp.lt.s32.totalorder %s2545_s24, %s2545_s24 }
  0x13   :  { %p2552_p8 = por %p2551_p7, %p2550_p6 }
  0x15   :  { %p2553_p9 = pnand %p2552_p8, %p2546_p5 }
  0x17   :  { %2556 = shalt.err (!%p2553_p9)
}
  0x18   :  { %s2607_s25 = smov 128   ;;  %s2608_s26 = smov 8  }
  0x19   :  { %23 = dma.hbm_to_vmem [thread:$0]  %s3378_s0, 2048, %s18_s23, [#allocation4], %s2607_s25, %s2607_s25, %s2608_s26  }
  0x1a   :  { %s2609_s1 = smov [#allocation8]  }
  0x1b   :  { %s41_s29 = sshll.u32 %s2609_s1, 4  ;;  %s42_s29 = int_to_ptr.vmem [resolvable:$true] %s41_s29 }
  0x1c   :  { %s2565_s30 = scalar_lea.vmem %s42_s29, 3456  ;;  %p2570_p11 = scmp.lt.s32.totalorder %s42_s29, %s42_s29 }
  0x1d   :  { %p2566_p10 = scmp.ne.s32.totalorder %s42_s29, %s2565_s30  ;;  %p2571_p12 = scmp.lt.s32.totalorder %s2565_s30, %s2565_s30 }
  0x1f   :  { %p2572_p13 = por %p2571_p12, %p2570_p11 }
  0x21   :  { %p2573_p0 = pnand %p2572_p13, %p2566_p10 }
  0x23   :  { %2576 = shalt.err (!%p2573_p0)
}
  0x24   :  { %47 = dma.hbm_to_vmem [thread:$0]  %s3380_s2, 3456, %s42_s29, [#allocation7], %s2604_s18, %s2604_s18, %s2605_s19  }
  0x25   :  { %2597 = dma.done.wait [#allocation4], 2048  }
  0x26   :  { %2598 = vsyncadd [#allocation4], 4294965248 }
  0x27   :  { %2599 = dma.done.wait [#allocation7], 6912  }
  0x28   :  { %2600 = vsyncadd [#allocation7], 4294960384  ;;  %vm61_vm0 = vcmask 130048   ;;  %v2610_v0 = vmov 0   ;;  %v2611_v1 = vmov 0.0   ;;  %v2462_v2 = vld [vmem:[#allocation6 + $0x80] sm:$0xff]  }
  0x29   :  { %543 = vmatprep.subr.bf16.mxu0 %v2610_v0  ;;  %722 = vmatprep.subr.bf16.mxu1 %v2610_v0  ;;  %62 = vst.msk [vmem:[#allocation2 + $0x8] sm:$0xff] %vm61_vm0, %v2611_v1  ;;  %63 = vst.msk [vmem:[#allocation2 + $0x18] sm:$0xff] %vm61_vm0, %v2611_v1  ;;  %v2463_v3 = vld [vmem:[#allocation6 + $0x38] sm:$0xff]   ;;  %v2465_v5 = vld [vmem:[#allocation6 + $0x30] sm:$0xff]   ;;  %vm310_vm1 = vsmask.f32 7424 }
  0x2a   :  { %64 = vst.msk [vmem:[#allocation2 + $0x28] sm:$0xff] %vm61_vm0, %v2611_v1  ;;  %65 = vst.msk [vmem:[#allocation2 + $0x38] sm:$0xff] %vm61_vm0, %v2611_v1  ;;  %544 = vmatpush1.bf16.msra.mxu0 %v2462_v2  ;;  %v2464_v4 = vld [vmem:[#allocation6 + $0x78] sm:$0xff]   ;;  %723 = vmatpush1.bf16.msra.mxu1 %v2463_v3  ;;  %v2466_v6 = vld [vmem:[#allocation6 + $0x70] sm:$0xff]   ;;  %vm100_vm2 = vcmask 1040384   ;;  %vm115_vm3 = vcmask 1042432  }
  0x2b   :  { %66 = vst.msk [vmem:[#allocation2 + $0x48] sm:$0xff] %vm61_vm0, %v2611_v1  ;;  %67 = vst.msk [vmem:[#allocation2 + $0x58] sm:$0xff] %vm61_vm0, %v2611_v1  ;;  %545 = vmatprep.subr.bf16.mxu0 %v2610_v0  ;;  %724 = vmatprep.subr.bf16.mxu1 %v2610_v0  ;;  %v2467_v7 = vld [vmem:[#allocation6 + $0x28] sm:$0xff]   ;;  %v2469_v9 = vld [vmem:[#allocation6 + $0x20] sm:$0xff]   ;;  %vm130_vm4 = vcmask 1044480   ;;  %vm145_vm5 = vcmask 1046528  }
  0x2c   :  { %68 = vst.msk [vmem:[#allocation2 + $0x68] sm:$0xff] %vm61_vm0, %v2611_v1  ;;  %69 = vst.msk [vmem:[#allocation2 + $0x78] sm:$0xff] %vm61_vm0, %v2611_v1  ;;  %v2468_v8 = vld [vmem:[#allocation6 + $0x68] sm:$0xff]   ;;  %v2470_v10 = vld [vmem:[#allocation6 + $0x60] sm:$0xff]   ;;  %vm2197_vm6 = vcmask 1041408   ;;  %vm2218_vm7 = vcmask 1043456  }
  0x2d   :  { %70 = vst.msk [vmem:[#allocation2 + $0x88] sm:$0xff] %vm61_vm0, %v2611_v1  ;;  %71 = vst.msk [vmem:[#allocation2 + $0x98] sm:$0xff] %vm61_vm0, %v2611_v1  ;;  %v2471_v11 = vld [vmem:[#allocation6 + $0x18] sm:$0xff]   ;;  %v2473_v13 = vld [vmem:[#allocation6 + $0x10] sm:$0xff]   ;;  %vm2239_vm8 = vcmask 1045504  }
  0x2e   :  { %72 = vst.msk [vmem:[#allocation2 + $0xa8] sm:$0xff] %vm61_vm0, %v2611_v1  ;;  %73 = vst.msk [vmem:[#allocation2 + $0xb8] sm:$0xff] %vm61_vm0, %v2611_v1  ;;  %546 = vmatpush1.bf16.msra.mxu0 %v2464_v4  ;;  %725 = vmatpush1.bf16.msra.mxu1 %v2465_v5  ;;  %v2472_v12 = vld [vmem:[#allocation6 + $0x58] sm:$0xff]   ;;  %v96_v20 = vld [vmem:[#allocation3] sm:$0xff] }
  0x2f   :  { %74 = vst.msk [vmem:[#allocation2 + $0xc8] sm:$0xff] %vm61_vm0, %v2611_v1  ;;  %75 = vst.msk [vmem:[#allocation2 + $0xd8] sm:$0xff] %vm61_vm0, %v2611_v1  ;;  %547 = vmatprep.subr.bf16.mxu0 %v2610_v0  ;;  %726 = vmatprep.subr.bf16.mxu1 %v2610_v0  ;;  %v97_v23 = vld [vmem:[#allocation3 + $0x8] sm:$0xff]  ;;  %v101_v24 = vrot.slane %v96_v20, 7  ;;  %v111_v25 = vld [vmem:[#allocation3 + $0x10] sm:$0xff] }
  0x30   :  { %76 = vst.msk [vmem:[#allocation2 + $0xe8] sm:$0xff] %vm61_vm0, %v2611_v1  ;;  %77 = vst.msk [vmem:[#allocation2 + $0xf8] sm:$0xff] %vm61_vm0, %v2611_v1  ;;  %v2678_v14 = vld [vmem:[#allocation2 + $0x18] sm:$0xff]  ;;  %v284_v18 = vld [vmem:[#allocation2 + $0x8] sm:$0xfe]  ;;  %v102_v29 = vrot.slane %v97_v23, 7 }
  0x31   :  { %78 = vst.msk [vmem:[#allocation2 + $0x108] sm:$0xff] %vm61_vm0, %v2611_v1  ;;  %79 = vst.msk [vmem:[#allocation2 + $0x118] sm:$0xff] %vm61_vm0, %v2611_v1  ;;  %v216_v15 = vld [vmem:[#allocation2 + $0x28] sm:$0xff]  ;;  %v218_v16 = vld [vmem:[#allocation2 + $0x38] sm:$0xff]  ;;  %v288_v21 = vpack.c.bf16 %v2678_v14, %v284_v18  ;;  %v116_v30 = vrot.slane %v111_v25, 5 }
  0x32   :  { %80 = vst [vmem:[#allocation2] sm:$0x1] %v2611_v1  ;;  %81 = vst [vmem:[#allocation2 + $0x21] sm:$0x1] %v2611_v1  ;;  %548 = vmatpush1.bf16.msra.mxu0 %v2466_v6  ;;  %727 = vmatpush1.bf16.msra.mxu1 %v2467_v7  ;;  %v2681_v17 = vpack.c.bf16 %v218_v16, %v216_v15  ;;  %v212_v19 = vld [vmem:[#allocation2 + $0x8] sm:$0xff]  ;;  %v112_v26 = vld [vmem:[#allocation3 + $0x18] sm:$0xff]  ;;  %v2698_v49 = vsel %vm100_vm2, %v101_v24, %v102_v29 }
  0x33   :  { %82 = vst [vmem:[#allocation2 + $0x22] sm:$0x1] %v2611_v1  ;;  %83 = vst [vmem:[#allocation2 + $0x43] sm:$0x1] %v2611_v1  ;;  %549 = vmatprep.subr.bf16.mxu0 %v2610_v0  ;;  %728 = vmatprep.subr.bf16.mxu1 %v2610_v0  ;;  %v248_v22 = vpack.c.bf16 %v2678_v14, %v212_v19  ;;  %v2474_v27 = vld [vmem:[#allocation6 + $0x50] sm:$0xff]   ;;  %v2475_v31 = vld [vmem:[#allocation6 + $0x8] sm:$0xff]  }
  0x34   :  { %84 = vst [vmem:[#allocation2 + $0x44] sm:$0x1] %v2611_v1  ;;  %85 = vst [vmem:[#allocation2 + $0x65] sm:$0x1] %v2611_v1  ;;  %v331_v28 = vshll.u32 %v2681_v17, 16  ;;  %v324_v32 = vshrl.u32 %v288_v21, 16 }
  0x35   :  { %86 = vst [vmem:[#allocation2 + $0x66] sm:$0x1] %v2611_v1  ;;  %87 = vst [vmem:[#allocation2 + $0x87] sm:$0x1] %v2611_v1  ;;  %v326_v33 = vshll.u32 %v288_v21, 16  ;;  %2370 = vmatprep.mubr.msk.bf16.mxu1 %vm61_vm0, %v248_v22  ;;  %v117_v34 = vrot.slane %v112_v26, 5 }
  0x36   :  { %88 = vst [vmem:[#allocation2 + $0x90] sm:$0x1] %v2611_v1  ;;  %89 = vst [vmem:[#allocation2 + $0xb1] sm:$0x1] %v2611_v1  ;;  %550 = vmatpush1.bf16.msra.mxu0 %v2468_v8  ;;  %729 = vmatpush1.bf16.msra.mxu1 %v2469_v9  ;;  %v220_v35 = vld [vmem:[#allocation2 + $0x48] sm:$0xff]  ;;  %v222_v36 = vld [vmem:[#allocation2 + $0x58] sm:$0xff] }
  0x37   :  { %90 = vst [vmem:[#allocation2 + $0xb2] sm:$0x1] %v2611_v1  ;;  %91 = vst [vmem:[#allocation2 + $0xd3] sm:$0x1] %v2611_v1  ;;  %551 = vmatprep.subr.bf16.mxu0 %v2610_v0  ;;  %730 = vmatprep.subr.bf16.mxu1 %v2610_v0  ;;  %v126_v37 = vld [vmem:[#allocation3 + $0x20] sm:$0xff]  ;;  %v328_v38 = vrot.slane %v326_v33, 1  ;;  %v2690_v43 = vpack.c.bf16 %v222_v36, %v220_v35  ;;  %v118_v54 = vsel %vm115_vm3, %v116_v30, %v117_v34 }
  0x38   :  { %92 = vst [vmem:[#allocation2 + $0xd4] sm:$0x1] %v2611_v1  ;;  %93 = vst [vmem:[#allocation2 + $0xf5] sm:$0x1] %v2611_v1  ;;  %v333_v39 = vrot.slane %v331_v28, 1  ;;  %v127_v40 = vld [vmem:[#allocation3 + $0x28] sm:$0xff] }
  0x39   :  { %94 = vst [vmem:[#allocation2 + $0xf6] sm:$0x1] %v2611_v1  ;;  %95 = vst [vmem:[#allocation2 + $0x117] sm:$0x1] %v2611_v1  ;;  %v131_v41 = vrot.slane %v126_v37, 3  ;;  %v2476_v42 = vld [vmem:[#allocation6 + $0x48] sm:$0xff]   ;;  %v329_v45 = vor.u32 %v328_v38, %v324_v32 }
  0x3a   :  { %552 = vmatpush1.bf16.msra.mxu0 %v2470_v10  ;;  %731 = vmatpush1.bf16.msra.mxu1 %v2471_v11  ;;  %107 = vst [vmem:[#allocation2] sm:$0xfe] %v101_v24  ;;  %109 = vst [vmem:[#allocation2 + $0x20] sm:$0x1] %v102_v29  ;;  %v132_v44 = vrot.slane %v127_v40, 3  ;;  %v2692_v46 = vld [vmem:[#allocation3 + $0x30] sm:$0xff] }
  0x3b   :  { %553 = vmatprep.subr.bf16.mxu0 %v2610_v0  ;;  %732 = vmatprep.subr.bf16.mxu1 %v2610_v0  ;;  %122 = vst [vmem:[#allocation2 + $0x20] sm:$0xf8] %v116_v30  ;;  %124 = vst [vmem:[#allocation2 + $0x40] sm:$0x7] %v117_v34  ;;  %v2694_v47 = vld [vmem:[#allocation3 + $0x38] sm:$0xff]  ;;  %v2477_v48 = vld [vmem:[#allocation6] sm:$0xff]   ;;  %v334_v52 = vsel %vm310_vm1, %v329_v45, %v333_v39 }
  0x3c   :  { %137 = vst [vmem:[#allocation2 + $0x40] sm:$0xe0] %v131_v41  ;;  %139 = vst [vmem:[#allocation2 + $0x60] sm:$0x1f] %v132_v44  ;;  %v146_v50 = vrot.slane %v2692_v46, 1  ;;  %v147_v51 = vrot.slane %v2694_v47, 1  ;;  %2352 = vmatprep.mubr.msk.bf16.mxu0 %vm61_vm0, %v334_v52  ;;  %v133_v4 = vsel %vm130_vm4, %v131_v41, %v132_v44 }
  0x3d   :  { %v343_v53 = vshrl.u32 %v2681_v17, 16  ;;  %v224_v55 = vld [vmem:[#allocation2 + $0x68] sm:$0xff]  ;;  %v226_v56 = vld [vmem:[#allocation2 + $0x78] sm:$0xff]  ;;  %v2706_v57 = vld [vmem:[#allocation3 + $0x40] sm:$0xff]  ;;  %v347_v59 = vshll.u32 %v2690_v43, 16  ;;  %v359_v34 = vshrl.u32 %v2690_v43, 16 }
  0x3e   :  { %554 = vmatpush1.bf16.msra.mxu0 %v2472_v12  ;;  %733 = vmatpush1.bf16.msra.mxu1 %v2473_v13  ;;  %152 = vst [vmem:[#allocation2 + $0x60] sm:$0x80] %v146_v50  ;;  %154 = vst [vmem:[#allocation2 + $0x80] sm:$0x7f] %v147_v51  ;;  %v160_v60 = vrot.slane %v2706_v57, 7  ;;  %v2478_v61 = vld [vmem:[#allocation6 + $0x88] sm:$0xff]   ;;  %v2723_v8 = vpack.c.bf16 %v226_v56, %v224_v55  ;;  %v148_v35 = vsel %vm145_vm5, %v146_v50, %v147_v51 }
  0x3f   :  { %555 = vmatprep.subr.bf16.mxu0 %v2610_v0  ;;  %734 = vmatprep.subr.bf16.mxu1 %v2610_v0  ;;  %v2479_v1 = vld [vmem:[#allocation6 + $0x40] sm:$0xff]   ;;  %v2720_v5 = vld [vmem:[#allocation3 + $0x48] sm:$0xff]  ;;  %v2726_v10 = vld [vmem:[#allocation3 + $0x50] sm:$0xff]  ;;  %v345_v11 = vor.u32 %v343_v53, %v333_v39  ;;  %v349_v13 = vrot.slane %v347_v59, 1  ;;  %v877_v44 = vrot.slane %v2681_v17, 1 }
  0x40   :  { %166 = vst [vmem:[#allocation2 + $0x90] sm:$0xfe] %v160_v60  ;;  %v161_v9 = vrot.slane %v2720_v5, 7  ;;  %v228_v16 = vld [vmem:[#allocation2 + $0x88] sm:$0xff]  ;;  %v230_v21 = vld [vmem:[#allocation2 + $0x98] sm:$0xff]  ;;  %v174_v25 = vrot.slane %v2726_v10, 5 }
  0x41   :  { %v283_v58 = vld [vmem:[#allocation2] sm:$0xfe]  ;;  %v232_v22 = vld [vmem:[#allocation2 + $0xa8] sm:$0xff]  ;;  %v234_v23 = vld [vmem:[#allocation2 + $0xb8] sm:$0xff]  ;;  %v363_v30 = vshll.u32 %v2723_v8, 16  ;;  %v350_v33 = vsel %vm310_vm1, %v345_v11, %v349_v13  ;;  %v2745_v37 = vpack.c.bf16 %v230_v21, %v228_v16  ;;  %v361_v51 = vor.u32 %v359_v34, %v349_v13 }
  0x42   :  { %556 = vmatpush1.bf16.msra.mxu0 %v2474_v27  ;;  %735 = vmatpush1.bf16.msra.mxu1 %v2475_v31  ;;  %v215_v62 = vld [vmem:[#allocation2 + $0x20] sm:$0xff]  ;;  %v287_v63 = vpack.c.bf16 %v2698_v49, %v283_v58  ;;  %168 = vst [vmem:[#allocation2 + $0xb0] sm:$0x1] %v161_v9  ;;  %v2480_v27 = vld [vmem:[#allocation6 + $0xc8] sm:$0xff]   ;;  %v238_v32 = vld [vmem:[#allocation2 + $0xd8] sm:$0xff]  ;;  %v2750_v39 = vpack.c.bf16 %v234_v23, %v232_v22 }
  0x43   :  { %557 = vmatprep.subr.bf16.mxu0 %v2610_v0  ;;  %736 = vmatprep.subr.bf16.mxu1 %v2610_v0  ;;  %v2715_v2 = vpack.c.bf16 %v118_v54, %v215_v62  ;;  %v211_v3 = vld [vmem:[#allocation2] sm:$0xff]  ;;  %v236_v31 = vld [vmem:[#allocation2 + $0xc8] sm:$0xff]  ;;  %180 = vst [vmem:[#allocation2 + $0xb0] sm:$0xf8] %v174_v25  ;;  %v2752_v40 = vld [vmem:[#allocation3 + $0x58] sm:$0xff]  ;;  %v379_v52 = vshll.u32 %v2745_v37, 16 }
  0x44   :  { %v312_v6 = vshrl.u32 %v287_v63, 16  ;;  %v314_v7 = vshll.u32 %v287_v63, 16  ;;  %v219_v15 = vld [vmem:[#allocation2 + $0x40] sm:$0xff]  ;;  %v247_v19 = vpack.c.bf16 %v2698_v49, %v211_v3  ;;  %v2756_v41 = vpack.c.bf16 %v238_v32, %v236_v31  ;;  %v2767_v54 = vld [vmem:[#allocation3 + $0x68] sm:$0xff]  ;;  %v2769_v55 = vld [vmem:[#allocation3 + $0x70] sm:$0xff] }
  0x45   :  { %v319_v12 = vshll.u32 %v2715_v2, 16  ;;  %v2730_v20 = vpack.c.bf16 %v133_v4, %v219_v15  ;;  %v335_v28 = vshrl.u32 %v2715_v2, 16  ;;  %v223_v36 = vld [vmem:[#allocation2 + $0x60] sm:$0xff]  ;;  %v175_v53 = vrot.slane %v2752_v40, 5  ;;  %v2778_v3 = vld [vmem:[#allocation3 + $0x78] sm:$0xff]  ;;  %v240_v34 = vld [vmem:[#allocation2 + $0xe8] sm:$0xff] }
  0x46   :  { %558 = vmatpush1.bf16.msra.mxu0 %v2476_v42  ;;  %737 = vmatpush1.bf16.msra.mxu1 %v2477_v48  ;;  %v316_v18 = vrot.slane %v314_v7, 1  ;;  %v2758_v42 = vld [vmem:[#allocation3 + $0x60] sm:$0xff]  ;;  %v365_v48 = vrot.slane %v363_v30, 1  ;;  %v2762_v50 = vpack.c.bf16 %v148_v35, %v223_v36  ;;  %v395_v59 = vshll.u32 %v2750_v39, 16  ;;  %v2482_v7 = vld [vmem:[#allocation6 + $0xb8] sm:$0xff]   ;;  %v2484_v36 = vld [vmem:[#allocation6 + $0xa8] sm:$0xff]  }
  0x47   :  { %573 = vmatprep.subr.bf16.mxu0 %v2610_v0  ;;  %752 = vmatprep.subr.bf16.mxu1 %v2610_v0  ;;  %v321_v24 = vrot.slane %v319_v12, 1  ;;  %v339_v29 = vshll.u32 %v2730_v20, 16  ;;  %v2481_v47 = vld [vmem:[#allocation6 + $0xc0] sm:$0xff]   ;;  %v229_v58 = vld [vmem:[#allocation2 + $0x90] sm:$0xff]  ;;  %v351_v62 = vshrl.u32 %v2730_v20, 16  ;;  %v375_v63 = vshrl.u32 %v2723_v8, 16 }
  0x48   :  { %v317_v26 = vor.u32 %v316_v18, %v312_v6  ;;  %v227_v56 = vld [vmem:[#allocation2 + $0x80] sm:$0xff]  ;;  %182 = vst [vmem:[#allocation2 + $0xd0] sm:$0x7] %v175_v53  ;;  %v355_v6 = vshll.u32 %v2762_v50, 16  ;;  %v189_v11 = vrot.slane %v2767_v54, 3  ;;  %v202_v12 = vrot.slane %v2769_v55, 1 }
  0x49   :  { %v337_v45 = vor.u32 %v335_v28, %v321_v24  ;;  %v341_v46 = vrot.slane %v339_v29, 1  ;;  %v366_v13 = vsel %vm310_vm1, %v361_v51, %v365_v48  ;;  %v381_v15 = vrot.slane %v379_v52, 1  ;;  %v828_v23 = vld [vmem:[#allocation2 + $0x8] sm:$0xfc]  ;;  %v827_v28 = vld [vmem:[#allocation2] sm:$0xfc] }
  0x4a   :  { %574 = vmatpush2.bf16.msra.mxu0 %v2478_v61  ;;  %753 = vmatpush2.bf16.msra.mxu1 %v2479_v1  ;;  %v322_v38 = vsel %vm310_vm1, %v317_v26, %v321_v24  ;;  %v188_v61 = vrot.slane %v2758_v42, 3  ;;  %v411_v1 = vshll.u32 %v2756_v41, 16  ;;  %v2788_v16 = vpack.c.bf16 %v229_v58, %v227_v56  ;;  %196 = vst [vmem:[#allocation2 + $0xf0] sm:$0x1f] %v189_v11 }
  0x4b   :  { %997 = vmatprep.subr.bf16.mxu0 %v2610_v0  ;;  %1591 = vmatprep.subr.bf16.mxu1 %v2610_v0  ;;  %v342_v4 = vsel %vm310_vm1, %v337_v45, %v341_v46  ;;  %v391_v18 = vshrl.u32 %v2745_v37, 16  ;;  %v2792_v21 = vrot.slane %v395_v59, 1  ;;  %208 = vst [vmem:[#allocation2 + $0xf0] sm:$0x80] %v202_v12  ;;  %v203_v22 = vrot.slane %v2778_v3, 1  ;;  %v2487_v3 = vld [vmem:[#allocation6 + $0x90] sm:$0xff]  }
  0x4c   :  { %194 = vst [vmem:[#allocation2 + $0xd0] sm:$0xe0] %v188_v61  ;;  %v377_v24 = vor.u32 %v375_v63, %v365_v48  ;;  %v367_v26 = vshrl.u32 %v2762_v50, 16  ;;  %v353_v29 = vor.u32 %v351_v62, %v341_v46  ;;  %v357_v30 = vrot.slane %v355_v6, 1  ;;  %v2485_v6 = vld [vmem:[#allocation6 + $0xa0] sm:$0xff]  }
  0x4d   :  { %755 = vmatmul.mubr.bf16.vlgmr.msra.gmra.mxu1 %v247_v19  ;;  %576 = vmatmul.mubr.bf16.vlgmr.msra.gmra.mxu0 %v322_v38  ;;  %v2483_v19 = vld [vmem:[#allocation6 + $0xb0] sm:$0xff]   ;;  %v2804_v31 = vrot.slane %v411_v1, 1  ;;  %210 = vst [vmem:[#allocation2 + $0x110] sm:$0x7f] %v203_v22  ;;  %v371_v32 = vshll.u32 %v2788_v16, 16  ;;  %v832_v35 = vpack.c.bf16 %v2678_v14, %v828_v23  ;;  %v242_v38 = vld [vmem:[#allocation2 + $0xf8] sm:$0xff]  ;;  %v831_v45 = vpack.c.bf16 %v2698_v49, %v827_v28 }
  0x4e   :  { %2371 = vmatprep.mubr.msk.bf16.mxu1 %vm61_vm0, %v2681_v17  ;;  %998 = vmatpush1.bf16.msra.mxu0 %v2480_v27  ;;  %v407_v27 = vshrl.u32 %v2750_v39, 16  ;;  %v881_v46 = vrot.slane %v2690_v43, 1  ;;  %v885_v48 = vrot.slane %v2723_v8, 1  ;;  %v382_v51 = vsel %vm310_vm1, %v377_v24, %v381_v15  ;;  %v233_v14 = vld [vmem:[#allocation2 + $0xb0] sm:$0xff] }
  0x4f   :  { %2353 = vmatprep.mubr.msk.bf16.mxu0 %vm61_vm0, %v350_v33  ;;  %999 = vmatprep.subr.bf16.mxu0 %v2610_v0  ;;  %v383_v33 = vshrl.u32 %v2788_v16, 16  ;;  %v393_v52 = vor.u32 %v391_v18, %v381_v15  ;;  %v162_v56 = vsel %vm100_vm2, %v160_v60, %v161_v9  ;;  %v874_v58 = vrot.slane %v2715_v2, 1  ;;  %v830_v15 = vld [vmem:[#allocation2 + $0x118] sm:$0xff] }
  0x50   :  { %v358_v49 = vsel %vm310_vm1, %v353_v29, %v357_v30  ;;  %v873_v59 = vrot.slane %v831_v45, 1  ;;  %v2827_v62 = vsel %vm145_vm5, %v877_v44, %v881_v46  ;;  %v2834_v57 = vsel %vm145_vm5, %v881_v46, %v885_v48 }
  0x51   :  { %v883_v60 = vrot.slane %v2762_v50, 1  ;;  %v2839_v9 = vpack.c.bf16 %v233_v14, %v162_v56  ;;  %v176_v63 = vsel %vm115_vm3, %v174_v25, %v175_v53  ;;  %v2846_v1 = vpack.c.bf16 %v242_v38, %v240_v34 }
  0x52   :  { %1000 = vmatpush1.bf16.msra.mxu0 %v2481_v47  ;;  %v879_v47 = vrot.slane %v2730_v20, 1  ;;  %v887_v17 = vrot.slane %v2788_v16, 1  ;;  %v369_v40 = vor.u32 %v367_v26, %v357_v30  ;;  %v190_v53 = vsel %vm130_vm4, %v188_v61, %v189_v11  ;;  %v2486_v61 = vld [vmem:[#allocation6 + $0x98] sm:$0xff]   ;;  %v2884_v11 = vld [vmem:[#allocation2 + $0x108] sm:$0xff] }
  0x53   :  { %1001 = vmatprep.subr.bf16.mxu0 %v2610_v0  ;;  %v891_v23 = vrot.slane %v2839_v9, 1  ;;  %v398_v24 = vsel %vm310_vm1, %v393_v52, %v2792_v21  ;;  %v387_v54 = vshll.u32 %v2839_v9, 16  ;;  %v427_v42 = vshll.u32 %v2846_v1, 16 }
  0x54   :  { %v2831_v5 = vsel %vm145_vm5, %v874_v58, %v879_v47  ;;  %v2859_v10 = vsel %vm145_vm5, %v879_v47, %v883_v60  ;;  %v2874_v18 = vsel %vm145_vm5, %v883_v60, %v887_v17  ;;  %v829_v34 = vld [vmem:[#allocation2 + $0x110] sm:$0xff]  ;;  %v2902_v38 = vsel %vm145_vm5, %v202_v12, %v203_v22 }
  0x55   :  { %763 = vmatmul.mubr.bf16.gmra.mxu1 %v2715_v2  ;;  %584 = vmatmul.mubr.bf16.gmra.mxu0 %v342_v4  ;;  %v889_v2 = vrot.slane %v2745_v37, 1  ;;  %v2892_v30 = vsel %vm145_vm5, %v887_v17, %v891_v23  ;;  %v901_v47 = vrot.slane %v2846_v1, 1  ;;  %v833_v12 = vpack.c.bf16 %v829_v34, %v2902_v38 }
  0x56   :  { %2372 = vmatprep.mubr.msk.bf16.mxu1 %vm61_vm0, %v2690_v43  ;;  %2354 = vmatprep.mubr.msk.bf16.mxu0 %vm61_vm0, %v366_v13  ;;  %v876_v43 = vrot.slane %v832_v35, 1  ;;  %v241_v13 = vld [vmem:[#allocation2 + $0xf0] sm:$0xff]  ;;  %v389_v22 = vrot.slane %v387_v54, 1 }
  0x57   :  { %1002 = vmatpush1.bf16.msra.mxu0 %v2482_v7  ;;  %v2856_v7 = vsel %vm145_vm5, %v873_v59, %v874_v58  ;;  %v2862_v25 = vsel %vm145_vm5, %v885_v48, %v889_v2  ;;  %v2886_v28 = vpack.c.bf16 %v241_v13, %v190_v53  ;;  %v2488_v59 = vld [vmem:[#allocation6 + $0xd0] sm:$0xff]   ;;  %v439_v53 = vshrl.u32 %v2846_v1, 16 }
  0x58   :  { %1003 = vmatprep.subr.bf16.mxu0 %v2610_v0  ;;  %v2851_v4 = vsel %vm145_vm5, %v876_v43, %v877_v44  ;;  %v373_v44 = vrot.slane %v371_v32, 1  ;;  %v897_v32 = vrot.slane %v2756_v41, 1 }
  0x59   :  { %v899_v48 = vrot.slane %v2886_v28, 1 }
  0x5a   :  { %v374_v35 = vsel %vm310_vm1, %v369_v40, %v373_v44  ;;  %v2920_v52 = vsel %vm145_vm5, %v897_v32, %v901_v47 }
  0x5b   :  { %1004 = vmatpush1.bf16.msra.mxu0 %v2483_v19  ;;  %v893_v19 = vrot.slane %v2750_v39, 1 }
  0x5c   :  { %1005 = vmatprep.subr.bf16.mxu0 %v2610_v0 }
  0x5d   :  { %771 = vmatmul.mubr.bf16.gmra.mxu1 %v2730_v20  ;;  %592 = vmatmul.mubr.bf16.gmra.mxu0 %v358_v49  ;;  %v237_v20 = vld [vmem:[#allocation2 + $0xd0] sm:$0xff]  ;;  %v2889_v29 = vsel %vm145_vm5, %v889_v2, %v893_v19  ;;  %v2907_v46 = vsel %vm145_vm5, %v893_v19, %v897_v32  ;;  %v2931_v49 = vrot.slane %v833_v12, 1  ;;  %v286_v2 = vld [vmem:[#allocation2 + $0x118] sm:$0x7f] }
  0x5e   :  { %2373 = vmatprep.mubr.msk.bf16.mxu1 %vm61_vm0, %v2723_v8  ;;  %2355 = vmatprep.mubr.msk.bf16.mxu0 %vm61_vm0, %v382_v51  ;;  %v423_v8 = vshrl.u32 %v2756_v41, 16  ;;  %v2881_v26 = vpack.c.bf16 %v237_v20, %v176_v63  ;;  %v834_v51 = vpack.c.bf16 %v830_v15, %v2884_v11  ;;  %v290_v17 = vpack.c.bf16 %v286_v2, %v2884_v11  ;;  %v285_v15 = vld [vmem:[#allocation2 + $0x110] sm:$0x7f]  ;;  %v3019_v12 = vld [vmem:[#allocation2 + $0x18] sm:$0xff]  ;;  %v2506_v2 = vld [vmem:[#allocation8 + $0x88] sm:$0xff]  }
  0x5f   :  { %1006 = vmatpush1.bf16.msra.mxu0 %v2484_v36  ;;  %v399_v36 = vshrl.u32 %v2839_v9, 16  ;;  %v2943_v60 = vsel %vm145_vm5, %v899_v48, %v2931_v49  ;;  %v289_v19 = vpack.c.bf16 %v285_v15, %v2902_v38 }
  0x60   :  { %1007 = vmatprep.subr.bf16.mxu0 %v2610_v0  ;;  %v895_v45 = vrot.slane %v2881_v26, 1  ;;  %v2925_v14 = vrot.slane %v834_v51, 1  ;;  %v403_v58 = vshll.u32 %v2881_v26, 16  ;;  %v425_v20 = vor.u32 %v423_v8, %v2804_v31 }
  0x61   :  { %v443_v13 = vshll.u32 %v290_v17, 16  ;;  %v450_v34 = vshrl.u32 %v290_v17, 16 }
  0x62   :  { %v2914_v55 = vsel %vm145_vm5, %v891_v23, %v895_v45  ;;  %v2923_v56 = vsel %vm145_vm5, %v895_v45, %v899_v48  ;;  %v2939_v43 = vsel %vm145_vm5, %v901_v47, %v2925_v14  ;;  %v245_v48 = vld [vmem:[#allocation2 + $0x110] sm:$0x3f] }
  0x63   :  { %1008 = vmatpush1.bf16.msra.mxu0 %v2485_v6  ;;  %v429_v6 = vrot.slane %v427_v42, 1  ;;  %v431_v42 = vshrl.u32 %v2886_v28, 16 }
  0x64   :  { %1009 = vmatprep.subr.bf16.mxu0 %v2610_v0 }
  0x65   :  { %779 = vmatmul.mubr.bf16.gmra.mxu1 %v2762_v50  ;;  %600 = vmatmul.mubr.bf16.gmra.mxu0 %v374_v35  ;;  %v385_v50 = vor.u32 %v383_v33, %v373_v44  ;;  %v419_v44 = vshll.u32 %v2886_v28, 16  ;;  %v441_v23 = vor.u32 %v439_v53, %v429_v6  ;;  %v246_v35 = vld [vmem:[#allocation2 + $0x118] sm:$0x3f] }
  0x66   :  { %2374 = vmatprep.mubr.msk.bf16.mxu1 %vm61_vm0, %v2745_v37  ;;  %2356 = vmatprep.mubr.msk.bf16.mxu0 %vm61_vm0, %v398_v24  ;;  %v409_v37 = vor.u32 %v407_v27, %v2792_v21  ;;  %v401_v21 = vor.u32 %v399_v36, %v389_v22  ;;  %v405_v27 = vrot.slane %v403_v58, 1  ;;  %v445_v24 = vrot.slane %v443_v13, 1  ;;  %v1265_v58 = vld [vmem:[#allocation2 + $0x28] sm:$0xff] }
  0x67   :  { %1010 = vmatpush1.bf16.msra.mxu0 %v2486_v61  ;;  %v390_v33 = vsel %vm310_vm1, %v385_v50, %v389_v22  ;;  %v421_v8 = vrot.slane %v419_v44, 1  ;;  %v435_v61 = vshll.u32 %v289_v19, 16  ;;  %v264_v36 = vpack.c.bf16 %v246_v35, %v2884_v11  ;;  %v2496_v11 = vld [vmem:[#allocation8 + $0x60] sm:$0xff]   ;;  %v2505_v50 = vld [vmem:[#allocation8 + $0x48] sm:$0xff]  }
  0x68   :  { %1011 = vmatprep.subr.bf16.mxu0 %v2610_v0  ;;  %v414_v63 = vsel %vm310_vm1, %v409_v37, %v2804_v31  ;;  %v406_v40 = vsel %vm310_vm1, %v401_v21, %v405_v27  ;;  %v446_v32 = vsel %vm310_vm1, %v441_v23, %v445_v24  ;;  %v452_v47 = vor.u32 %v450_v34, %v445_v24 }
  0x6b   :  { %1012 = vmatpush1.bf16.msra.mxu0 %v2487_v3  ;;  %v2504_v3 = vld [vmem:[#allocation8 + $0x40] sm:$0xff]  }
  0x6c   :  { %1027 = vmatprep.subr.bf16.mxu0 %v2610_v0 }
  0x6d   :  { %787 = vmatmul.mubr.bf16.gmra.mxu1 %v2788_v16  ;;  %608 = vmatmul.mubr.bf16.gmra.mxu0 %v390_v33  ;;  %v415_v16 = vshrl.u32 %v2881_v26, 16 }
  0x6e   :  { %2375 = vmatprep.mubr.msk.bf16.mxu1 %vm61_vm0, %v2750_v39  ;;  %2357 = vmatprep.mubr.msk.bf16.mxu0 %vm61_vm0, %v414_v63  ;;  %v430_v39 = vsel %vm310_vm1, %v425_v20, %v429_v6 }
  0x6f   :  { %1028 = vmatpush2.bf16.msra.mxu0 %v2488_v59  ;;  %v417_v31 = vor.u32 %v415_v16, %v405_v27 }
  0x70   :  { %1770 = vmatprep.subr.bf16.mxu0 %v2610_v0 }
  0x71   :  { %v422_v54 = vsel %vm310_vm1, %v417_v31, %v421_v8 }
  0x75   :  { %795 = vmatmul.mubr.bf16.gmra.mxu1 %v2839_v9  ;;  %616 = vmatmul.mubr.bf16.gmra.mxu0 %v406_v40  ;;  %v437_v9 = vrot.slane %v435_v61, 1 }
  0x76   :  { %2376 = vmatprep.mubr.msk.bf16.mxu1 %vm61_vm0, %v2756_v41  ;;  %2358 = vmatprep.mubr.msk.bf16.mxu0 %vm61_vm0, %v430_v39  ;;  %v433_v41 = vor.u32 %v431_v42, %v421_v8 }
  0x78   :  { %v438_v45 = vsel %vm310_vm1, %v433_v41, %v437_v9 }
  0x7d   :  { %803 = vmatmul.mubr.bf16.gmra.mxu1 %v2881_v26  ;;  %624 = vmatmul.mubr.bf16.gmra.mxu0 %v422_v54  ;;  %v447_v26 = vshrl.u32 %v289_v19, 16 }
  0x7e   :  { %2377 = vmatprep.mubr.msk.bf16.mxu1 %vm61_vm0, %v2846_v1  ;;  %2359 = vmatprep.mubr.msk.bf16.mxu0 %vm61_vm0, %v446_v32  ;;  %v263_v1 = vpack.c.bf16 %v245_v48, %v2902_v38  ;;  %v2503_v38 = vld [vmem:[#allocation8] sm:$0xff]  }
  0x7f   :  { %v449_v51 = vor.u32 %v447_v26, %v437_v9 }
  0x85   :  { %811 = vmatmul.mubr.bf16.gmra.mxu1 %v2886_v28  ;;  %632 = vmatmul.mubr.bf16.gmra.mxu0 %v438_v45  ;;  %v2498_v28 = vld [vmem:[#allocation8 + $0x18] sm:$0xff]  }
  0x86   :  { %2378 = vmatprep.mubr.msk.bf16.mxu1 %vm61_vm0, %v264_v36  ;;  %2360 = vmatprep.mubr.msk.bf16.mxu0 %vm61_vm0, %v452_v47 }
  0x8d   :  { %819 = vmatmul.mubr.bf16.gmra.mxu1 %v263_v1  ;;  %640 = vmatmul.mubr.bf16.gmra.mxu0 %v449_v51 }
  0x8e   :  { %2388 = vmatprep.mubr.msk.bf16.mxu0 %vm61_vm0, %v2851_v4  ;;  %v2489_v4 = vld [vmem:[#allocation8 + $0x80] sm:$0xff]  }
  0x8f   :  { %1592 = vmatpush1.bf16.msra.mxu1 %v2489_v4 }
  0x90   :  { %1593 = vmatprep.subr.bf16.mxu1 %v2610_v0 }
  0x95   :  { %1030 = vmatmul.mubr.bf16.vlgmr.msra.gmra.mxu0 %v2856_v7  ;;  %v2494_v7 = vld [vmem:[#allocation8 + $0x30] sm:$0xff]  }
  0x96   :  { %2389 = vmatprep.mubr.msk.bf16.mxu0 %vm61_vm0, %v2827_v62  ;;  %v2490_v62 = vld [vmem:[#allocation8 + $0x78] sm:$0xff]  }
  0x97   :  { %1594 = vmatpush1.bf16.msra.mxu1 %v2490_v62 }
  0x98   :  { %1595 = vmatprep.subr.bf16.mxu1 %v2610_v0 }
  0x9d   :  { %1038 = vmatmul.mubr.bf16.gmra.mxu0 %v2831_v5  ;;  %v2491_v5 = vld [vmem:[#allocation8 + $0x70] sm:$0xff]  }
  0x9e   :  { %2390 = vmatprep.mubr.msk.bf16.mxu0 %vm61_vm0, %v2834_v57  ;;  %v2492_v57 = vld [vmem:[#allocation8 + $0x38] sm:$0xff]   ;;  %1596 = vmatpush1.bf16.msra.mxu1 %v2491_v5 }
  0x9f   :  { %1597 = vmatprep.subr.bf16.mxu1 %v2610_v0  ;;  %1771 = vmatpush1.bf16.msra.mxu0 %v2492_v57 }
  0xa0   :  { %1772 = vmatprep.subr.bf16.mxu0 %v2610_v0 }
  0xa3   :  { %1773 = vmatpush1.bf16.msra.mxu0 %v2494_v7 }
  0xa4   :  { %1774 = vmatprep.subr.bf16.mxu0 %v2610_v0 }
  0xa5   :  { %1046 = vmatmul.mubr.bf16.gmra.mxu0 %v2859_v10  ;;  %v2493_v10 = vld [vmem:[#allocation8 + $0x68] sm:$0xff]  }
  0xa6   :  { %2391 = vmatprep.mubr.msk.bf16.mxu0 %vm61_vm0, %v2862_v25  ;;  %v2495_v25 = vld [vmem:[#allocation8 + $0x28] sm:$0xff]   ;;  %1598 = vmatpush1.bf16.msra.mxu1 %v2493_v10 }
  0xa7   :  { %1599 = vmatprep.subr.bf16.mxu1 %v2610_v0  ;;  %1775 = vmatpush1.bf16.msra.mxu0 %v2495_v25 }
  0xa8   :  { %1776 = vmatprep.subr.bf16.mxu0 %v2610_v0 }
  0xaa   :  { %1600 = vmatpush1.bf16.msra.mxu1 %v2496_v11 }
  0xab   :  { %1601 = vmatprep.subr.bf16.mxu1 %v2610_v0 }
  0xad   :  { %1054 = vmatmul.mubr.bf16.gmra.mxu0 %v2874_v18  ;;  %v2497_v18 = vld [vmem:[#allocation8 + $0x20] sm:$0xff]  }
  0xae   :  { %2392 = vmatprep.mubr.msk.bf16.mxu0 %vm61_vm0, %v2889_v29  ;;  %1777 = vmatpush1.bf16.msra.mxu0 %v2497_v18  ;;  %v2500_v29 = vld [vmem:[#allocation8 + $0x10] sm:$0xff]  }
  0xaf   :  { %1778 = vmatprep.subr.bf16.mxu0 %v2610_v0 }
  0xb2   :  { %1779 = vmatpush1.bf16.msra.mxu0 %v2498_v28 }
  0xb3   :  { %1780 = vmatprep.subr.bf16.mxu0 %v2610_v0 }
  0xb5   :  { %1062 = vmatmul.mubr.bf16.gmra.mxu0 %v2892_v30  ;;  %v2501_v30 = vld [vmem:[#allocation8 + $0x8] sm:$0xff]  }
  0xb6   :  { %2393 = vmatprep.mubr.msk.bf16.mxu0 %vm61_vm0, %v2907_v46  ;;  %1781 = vmatpush1.bf16.msra.mxu0 %v2500_v29  ;;  %v2499_v46 = vld [vmem:[#allocation8 + $0x58] sm:$0xff]  }
  0xb7   :  { %1782 = vmatprep.subr.bf16.mxu0 %v2610_v0  ;;  %1602 = vmatpush1.bf16.msra.mxu1 %v2499_v46 }
  0xb8   :  { %1603 = vmatprep.subr.bf16.mxu1 %v2610_v0 }
  0xba   :  { %1783 = vmatpush1.bf16.msra.mxu0 %v2501_v30 }
  0xbb   :  { %1784 = vmatprep.subr.bf16.mxu0 %v2610_v0 }
  0xbd   :  { %1070 = vmatmul.mubr.bf16.gmra.mxu0 %v2914_v55  ;;  %v1261_v55 = vld [vmem:[#allocation2 + $0x8] sm:$0xff] }
  0xbe   :  { %2394 = vmatprep.mubr.msk.bf16.mxu0 %vm61_vm0, %v2920_v52  ;;  %1785 = vmatpush1.bf16.msra.mxu0 %v2503_v38  ;;  %v1297_v22 = vpack.c.bf16 %v3019_v12, %v1261_v55  ;;  %v2502_v52 = vld [vmem:[#allocation8 + $0x50] sm:$0xff]  }
  0xbf   :  { %1800 = vmatprep.subr.bf16.mxu0 %v2610_v0  ;;  %1604 = vmatpush1.bf16.msra.mxu1 %v2502_v52 }
  0xc0   :  { %1605 = vmatprep.subr.bf16.mxu1 %v2610_v0 }
  0xc2   :  { %1801 = vmatpush2.bf16.msra.mxu0 %v2504_v3 }
  0xc3   :  { %1606 = vmatpush1.bf16.msra.mxu1 %v2505_v50 }
  0xc4   :  { %1621 = vmatprep.subr.bf16.mxu1 %v2610_v0 }
  0xc5   :  { %1078 = vmatmul.mubr.bf16.gmra.mxu0 %v2923_v56  ;;  %v1333_v56 = vld [vmem:[#allocation2 + $0x8] sm:$0xfe] }
  0xc6   :  { %2395 = vmatprep.mubr.msk.bf16.mxu0 %vm61_vm0, %v2939_v43 }
  0xc7   :  { %1622 = vmatpush2.bf16.msra.mxu1 %v2506_v2 }
  0xc8   :  { %2044 = vmatprep.subr.bf16.mxu1 %v2610_v0 }
  0xcd   :  { %1086 = vmatmul.mubr.bf16.gmra.mxu0 %v2943_v60 }
  0xce   :  { %2396 = vmatprep.mubr.msk.bf16.mxu0 %vm61_vm0, %v2925_v14  ;;  %v1337_v14 = vpack.c.bf16 %v3019_v12, %v1333_v56 }
  0xd0   :  { %v1374_v43 = vshll.u32 %v1337_v14, 16  ;;  %v1372_v59 = vshrl.u32 %v1337_v14, 16 }
  0xd2   :  { %v1376_v60 = vrot.slane %v1374_v43, 1 }
  0xd4   :  { %v1377_v63 = vor.u32 %v1376_v60, %v1372_v59 }
  0xd5   :  { %1094 = vmatmul.mubr.bf16.gmra.mxu0 %v2931_v49  ;;  %v1267_v49 = vld [vmem:[#allocation2 + $0x38] sm:$0xff] }
  0xd6   :  { %2425 = vmatprep.mubr.msk.bf16.mxu0 %vm61_vm0, %v1297_v22  ;;  %v3026_v37 = vpack.c.bf16 %v1267_v49, %v1265_v58 }
  0xd8   :  { %v1379_v33 = vshll.u32 %v3026_v37, 16 }
  0xda   :  { %v3030_v21 = vrot.slane %v1379_v33, 1 }
  0xdc   :  { %v1382_v27 = vsel %vm310_vm1, %v1377_v63, %v3030_v21 }
  0xdd   :  { %2407 = vmatprep.mubr.msk.bf16.mxu1 %vm61_vm0, %v1382_v27 }
 0x10d   :  { %v756_v20 = vpop.f32.mrf.mxu1  ;;  %v577_v6 = vpop.f32.mrf.mxu0 }
 0x10e   :  { %v3036_v17 = vadd.f32 %v756_v20, %v577_v6 }
 0x10f   :  { %v758_v40 = vpop.f32.mrf.mxu1  ;;  %v579_v16 = vpop.f32.mrf.mxu0 }
 0x111   :  { %v759_v44 = vpop.f32.mrf.mxu1  ;;  %v580_v39 = vpop.f32.mrf.mxu0 }
 0x112   :  { %v3038_v53 = vadd.f32 %v759_v44, %v580_v39 }
 0x113   :  { %v761_v13 = vpop.f32.mrf.mxu1  ;;  %v582_v15 = vpop.f32.mrf.mxu0 }
 0x115   :  { %v764_v31 = vpop.f32.mrf.mxu1  ;;  %v585_v8 = vpop.f32.mrf.mxu0 }
 0x116   :  { %v3040_v19 = vadd.f32 %v764_v31, %v585_v8 }
 0x117   :  { %v766_v23 = vpop.f32.mrf.mxu1  ;;  %v587_v24 = vpop.f32.mrf.mxu0 }
 0x119   :  { %v767_v54 = vpop.f32.mrf.mxu1  ;;  %v588_v42 = vpop.f32.mrf.mxu0 }
 0x11a   :  { %v3042_v61 = vadd.f32 %v767_v54, %v588_v42 }
 0x11b   :  { %v769_v32 = vpop.f32.mrf.mxu1  ;;  %v590_v41 = vpop.f32.mrf.mxu0 }
 0x11d   :  { %v772_v9 = vpop.f32.mrf.mxu1  ;;  %v593_v34 = vpop.f32.mrf.mxu0 }
 0x11e   :  { %v3044_v35 = vadd.f32 %v772_v9, %v593_v34 }
 0x11f   :  { %v774_v36 = vpop.f32.mrf.mxu1  ;;  %v595_v45 = vpop.f32.mrf.mxu0 }
 0x121   :  { %v775_v47 = vpop.f32.mrf.mxu1  ;;  %v596_v26 = vpop.f32.mrf.mxu0 }
 0x122   :  { %v3046_v48 = vadd.f32 %v775_v47, %v596_v26 }
 0x123   :  { %v777_v1 = vpop.f32.mrf.mxu1  ;;  %v598_v51 = vpop.f32.mrf.mxu0 }
 0x125   :  { %v780_v4 = vpop.f32.mrf.mxu1  ;;  %v601_v62 = vpop.f32.mrf.mxu0 }
 0x126   :  { %v3048_v5 = vadd.f32 %v780_v4, %v601_v62 }
 0x127   :  { %v782_v57 = vpop.f32.mrf.mxu1  ;;  %v603_v7 = vpop.f32.mrf.mxu0 }
 0x129   :  { %v783_v10 = vpop.f32.mrf.mxu1  ;;  %v604_v25 = vpop.f32.mrf.mxu0 }
 0x12a   :  { %v3050_v18 = vadd.f32 %v783_v10, %v604_v25 }
 0x12b   :  { %v785_v11 = vpop.f32.mrf.mxu1  ;;  %v606_v28 = vpop.f32.mrf.mxu0 }
 0x12c   :  { %v3075_v11 = vld [vmem:[%s3381_s3] ss:$0 sm:$0xff] }
 0x12d   :  { %v788_v29 = vpop.f32.mrf.mxu1  ;;  %v609_v30 = vpop.f32.mrf.mxu0 }
 0x12e   :  { %v3052_v38 = vadd.f32 %v788_v29, %v609_v30 }
 0x12f   :  { %v790_v46 = vpop.f32.mrf.mxu1  ;;  %v611_v3 = vpop.f32.mrf.mxu0 }
 0x131   :  { %v791_v55 = vpop.f32.mrf.mxu1  ;;  %v612_v22 = vpop.f32.mrf.mxu0 }
 0x132   :  { %v3054_v52 = vadd.f32 %v791_v55, %v612_v22 }
 0x133   :  { %v793_v56 = vpop.f32.mrf.mxu1  ;;  %v614_v14 = vpop.f32.mrf.mxu0 }
 0x135   :  { %v796_v50 = vpop.f32.mrf.mxu1  ;;  %v617_v58 = vpop.f32.mrf.mxu0 }
 0x136   :  { %v3056_v49 = vadd.f32 %v796_v50, %v617_v58 }
 0x137   :  { %v798_v43 = vpop.f32.mrf.mxu1  ;;  %v619_v59 = vpop.f32.mrf.mxu0 }
 0x139   :  { %v799_v60 = vpop.f32.mrf.mxu1  ;;  %v620_v33 = vpop.f32.mrf.mxu0 }
 0x13a   :  { %v3058_v2 = vadd.f32 %v799_v60, %v620_v33 }
 0x13b   :  { %v801_v63 = vpop.f32.mrf.mxu1  ;;  %v622_v27 = vpop.f32.mrf.mxu0 }
 0x13d   :  { %v804_v20 = vpop.f32.mrf.mxu1  ;;  %v625_v6 = vpop.f32.mrf.mxu0 }
 0x13e   :  { %v3060_v40 = vadd.f32 %v804_v20, %v625_v6 }
 0x13f   :  { %v806_v16 = vpop.f32.mrf.mxu1  ;;  %v627_v44 = vpop.f32.mrf.mxu0 }
 0x141   :  { %v807_v39 = vpop.f32.mrf.mxu1  ;;  %v628_v13 = vpop.f32.mrf.mxu0 }
 0x142   :  { %v3062_v15 = vadd.f32 %v807_v39, %v628_v13  ;;  %v1269_v39 = vld [vmem:[#allocation2 + $0x48] sm:$0xff]  ;;  %v1271_v13 = vld [vmem:[#allocation2 + $0x58] sm:$0xff] }
 0x143   :  { %v809_v31 = vpop.f32.mrf.mxu1  ;;  %v630_v8 = vpop.f32.mrf.mxu0 }
 0x145   :  { %v812_v23 = vpop.f32.mrf.mxu1  ;;  %v633_v24 = vpop.f32.mrf.mxu0 }
 0x146   :  { %v3064_v54 = vadd.f32 %v812_v23, %v633_v24 }
 0x147   :  { %v814_v42 = vpop.f32.mrf.mxu1  ;;  %v635_v32 = vpop.f32.mrf.mxu0 }
 0x149   :  { %v815_v41 = vpop.f32.mrf.mxu1  ;;  %v636_v9 = vpop.f32.mrf.mxu0 }
 0x14a   :  { %v3066_v34 = vadd.f32 %v815_v41, %v636_v9  ;;  %v3087_v9 = vpack.c.bf16 %v1271_v13, %v1269_v39  ;;  %v2507_v13 = vld [vmem:[#allocation8 + $0xc8] sm:$0xff]  }
 0x14b   :  { %v817_v36 = vpop.f32.mrf.mxu1  ;;  %v638_v45 = vpop.f32.mrf.mxu0 }
 0x14d   :  { %v820_v47 = vpop.f32.mrf.mxu1  ;;  %v641_v26 = vpop.f32.mrf.mxu0 }
 0x14e   :  { %v3068_v1 = vadd.f32 %v820_v47, %v641_v26 }
 0x14f   :  { %v822_v51 = vpop.f32.mrf.mxu1  ;;  %v643_v4 = vpop.f32.mrf.mxu0 }
 0x151   :  { %v823_v62 = vpop.f32.mrf.mxu1  ;;  %v644_v57 = vpop.f32.mrf.mxu0 }
 0x152   :  { %v3070_v7 = vadd.f32 %v823_v62, %v644_v57  ;;  %v1391_v57 = vshrl.u32 %v3026_v37, 16 }
 0x153   :  { %v825_v10 = vpop.f32.mrf.mxu1  ;;  %v646_v25 = vpop.f32.mrf.mxu0 }
 0x154   :  { %v1395_v10 = vshll.u32 %v3087_v9, 16 }
 0x155   :  { %v1031_v28 = vpop.f32.mrf.mxu0 }
 0x156   :  { %v1102_v29 = vadd.f32 %v1031_v28, %v3036_v17 }
 0x157   :  { %v1033_v30 = vpop.f32.mrf.mxu0 }
 0x158   :  { %v1126_v46 = vadd.f32 %v3075_v11, %v1102_v29  ;;  %v1273_v29 = vld [vmem:[#allocation2 + $0x68] sm:$0xff]  ;;  %v1275_v30 = vld [vmem:[#allocation2 + $0x78] sm:$0xff] }
 0x159   :  { %v1034_v3 = vpop.f32.mrf.mxu0 }
 0x15a   :  { %v1144_v55 = vmax.f32 %v1126_v46, 0.0  ;;  %v1103_v22 = vadd.f32 %v1034_v3, %v3038_v53 }
 0x15b   :  { %v1036_v56 = vpop.f32.mrf.mxu0 }
 0x15c   :  { %v1164_v14 = vrot.slane %v1144_v55, 7  ;;  %v1127_v50 = vadd.f32 %v3075_v11, %v1103_v22 }
 0x15d   :  { %v1039_v58 = vpop.f32.mrf.mxu0 }
 0x15e   :  { %1170 = vst [vmem:[#allocation2] sm:$0xfe] %v1164_v14  ;;  %v1145_v43 = vmax.f32 %v1127_v50, 0.0  ;;  %v1104_v59 = vadd.f32 %v1039_v58, %v3040_v19 }
 0x15f   :  { %v1041_v60 = vpop.f32.mrf.mxu0 }
 0x160   :  { %v1165_v33 = vrot.slane %v1145_v43, 7  ;;  %v1128_v17 = vadd.f32 %v3075_v11, %v1104_v59  ;;  %v1393_v59 = vor.u32 %v1391_v57, %v3030_v21  ;;  %v1397_v60 = vrot.slane %v1395_v10, 1 }
 0x161   :  { %v1042_v63 = vpop.f32.mrf.mxu0 }
 0x162   :  { %v1166_v27 = vsel %vm100_vm2, %v1164_v14, %v1165_v33  ;;  %1172 = vst [vmem:[#allocation2 + $0x20] sm:$0x1] %v1165_v33  ;;  %v1146_v20 = vmax.f32 %v1128_v17, 0.0  ;;  %v1105_v53 = vadd.f32 %v1042_v63, %v3042_v61  ;;  %v3102_v33 = vpack.c.bf16 %v1275_v30, %v1273_v29 }
 0x163   :  { %v1044_v6 = vpop.f32.mrf.mxu0 }
 0x164   :  { %v1176_v16 = vrot.slane %v1146_v20, 7  ;;  %v1129_v44 = vadd.f32 %v3075_v11, %v1105_v53 }
 0x165   :  { %v1047_v31 = vpop.f32.mrf.mxu0  ;;  %v1260_v8 = vld [vmem:[#allocation2] sm:$0xff] }
 0x166   :  { %v1332_v19 = vld [vmem:[#allocation2] sm:$0xfe]  ;;  %1184 = vst [vmem:[#allocation2 + $0x20] sm:$0xf8] %v1176_v16  ;;  %v1147_v23 = vmax.f32 %v1129_v44, 0.0  ;;  %v1106_v24 = vadd.f32 %v1047_v31, %v3044_v35  ;;  %v1296_v42 = vpack.c.bf16 %v1166_v27, %v1260_v8  ;;  %v1398_v8 = vsel %vm310_vm1, %v1393_v59, %v1397_v60 }
 0x167   :  { %v1336_v32 = vpack.c.bf16 %v1166_v27, %v1332_v19  ;;  %v1049_v41 = vpop.f32.mrf.mxu0  ;;  %v1875_v35 = vld [vmem:[#allocation2] sm:$0xfc]  ;;  %v1407_v19 = vshrl.u32 %v3087_v9, 16 }
 0x168   :  { %v1177_v36 = vrot.slane %v1147_v23, 7  ;;  %v1130_v61 = vadd.f32 %v3075_v11, %v1106_v24  ;;  %1803 = vmatmul.mubr.bf16.vlgmr.msra.gmra.mxu0 %v1296_v42  ;;  %v1879_v22 = vpack.c.bf16 %v1166_v27, %v1875_v35  ;;  %v1411_v23 = vshll.u32 %v3102_v33, 16 }
 0x169   :  { %v1050_v45 = vpop.f32.mrf.mxu0  ;;  %2426 = vmatprep.mubr.msk.bf16.mxu0 %vm61_vm0, %v3026_v37  ;;  %v1362_v47 = vshll.u32 %v1336_v32, 16  ;;  %v1360_v43 = vshrl.u32 %v1336_v32, 16  ;;  %v1409_v57 = vor.u32 %v1407_v19, %v1397_v60 }
 0x16a   :  { %v1178_v26 = vsel %vm100_vm2, %v1176_v16, %v1177_v36  ;;  %v1148_v51 = vmax.f32 %v1130_v61, 0.0  ;;  %v1107_v4 = vadd.f32 %v1050_v45, %v3046_v48  ;;  %v1279_v61 = vld [vmem:[#allocation2 + $0x98] sm:$0xff]  ;;  %v1413_v10 = vrot.slane %v1411_v23, 1  ;;  %v1281_v23 = vld [vmem:[#allocation2 + $0xa8] sm:$0xff] }
 0x16b   :  { %v1052_v62 = vpop.f32.mrf.mxu0  ;;  %v1364_v55 = vrot.slane %v1362_v47, 1 }
 0x16c   :  { %v1179_v25 = vrot.slane %v1148_v51, 7  ;;  %v1131_v28 = vadd.f32 %v3075_v11, %v1107_v4  ;;  %v2508_v4 = vld [vmem:[#allocation8 + $0xc0] sm:$0xff]  }
 0x16d   :  { %v1055_v46 = vpop.f32.mrf.mxu0  ;;  %v1264_v3 = vld [vmem:[#allocation2 + $0x20] sm:$0xff]  ;;  %v1365_v53 = vor.u32 %v1364_v55, %v1360_v43  ;;  %v1414_v43 = vsel %vm310_vm1, %v1409_v57, %v1413_v10 }
 0x16e   :  { %v1180_v56 = vsel %vm100_vm2, %v1177_v36, %v1179_v25  ;;  %1196 = vst [vmem:[#allocation2 + $0x40] sm:$0xe0] %v1179_v25  ;;  %v1149_v14 = vmax.f32 %v1131_v28, 0.0  ;;  %v1108_v48 = vadd.f32 %v1055_v46, %v3048_v5  ;;  %v3099_v50 = vpack.c.bf16 %v1178_v26, %v1264_v3 }
 0x16f   :  { %1186 = vst [vmem:[#allocation2 + $0x40] sm:$0x7] %v1180_v56  ;;  %v1057_v58 = vpop.f32.mrf.mxu0  ;;  %v1920_v5 = vrot.slane %v1879_v22, 1 }
 0x170   :  { %v1189_v17 = vrot.slane %v1149_v14, 7  ;;  %v1132_v63 = vadd.f32 %v3075_v11, %v1108_v48  ;;  %1811 = vmatmul.mubr.bf16.gmra.mxu0 %v3099_v50  ;;  %v1367_v27 = vshll.u32 %v3099_v50, 16  ;;  %v1921_v6 = vrot.slane %v3099_v50, 1 }
 0x171   :  { %v1058_v20 = vpop.f32.mrf.mxu0  ;;  %2427 = vmatprep.mubr.msk.bf16.mxu0 %vm61_vm0, %v3087_v9 }
 0x172   :  { %v1190_v21 = vsel %vm100_vm2, %v1179_v25, %v1189_v17  ;;  %v1150_v16 = vmax.f32 %v1132_v63, 0.0  ;;  %v1109_v44 = vadd.f32 %v1058_v20, %v3050_v18  ;;  %v1369_v39 = vrot.slane %v1367_v27, 1  ;;  %v1277_v18 = vld [vmem:[#allocation2 + $0x88] sm:$0xff] }
 0x173   :  { %v1060_v31 = vpop.f32.mrf.mxu0  ;;  %v3116_v24 = vsel %vm145_vm5, %v1920_v5, %v1921_v6  ;;  %v3127_v29 = vpack.c.bf16 %v1279_v61, %v1277_v18 }
 0x174   :  { %v1191_v42 = vrot.slane %v1150_v16, 7  ;;  %v1133_v32 = vadd.f32 %v3075_v11, %v1109_v44  ;;  %v1370_v41 = vsel %vm310_vm1, %v1365_v53, %v1369_v39 }
 0x175   :  { %v1063_v36 = vpop.f32.mrf.mxu0  ;;  %1624 = vmatmul.mubr.bf16.vlgmr.msra.gmra.mxu1 %v1370_v41  ;;  %v1427_v63 = vshll.u32 %v3127_v29, 16 }
 0x176   :  { %v1192_v45 = vsel %vm100_vm2, %v1189_v17, %v1191_v42  ;;  %1208 = vst [vmem:[#allocation2 + $0x60] sm:$0x80] %v1191_v42  ;;  %v1151_v47 = vmax.f32 %v1133_v32, 0.0  ;;  %v1110_v26 = vadd.f32 %v1063_v36, %v3052_v38  ;;  %2045 = vmatpush1.bf16.msra.mxu1 %v2507_v13  ;;  %v1268_v51 = vld [vmem:[#allocation2 + $0x40] sm:$0xff]  ;;  %2408 = vmatprep.mubr.msk.bf16.mxu1 %vm61_vm0, %v1398_v8  ;;  %v1383_v38 = vshrl.u32 %v3099_v50, 16  ;;  %v2509_v50 = vld [vmem:[#allocation8 + $0xb8] sm:$0xff]  }
 0x177   :  { %1198 = vst [vmem:[#allocation2 + $0x60] sm:$0x1f] %v1192_v45  ;;  %v1065_v35 = vpop.f32.mrf.mxu0  ;;  %v3123_v62 = vpack.c.bf16 %v1190_v21, %v1268_v51  ;;  %2046 = vmatprep.subr.bf16.mxu1 %v2610_v0  ;;  %v1429_v19 = vrot.slane %v1427_v63, 1 }
 0x178   :  { %v1201_v25 = vrot.slane %v1151_v47, 7  ;;  %v1134_v28 = vadd.f32 %v3075_v11, %v1110_v26  ;;  %v1385_v48 = vor.u32 %v1383_v38, %v1369_v39  ;;  %v2510_v39 = vld [vmem:[#allocation8 + $0xb0] sm:$0xff]  }
 0x179   :  { %v1066_v30 = vpop.f32.mrf.mxu0  ;;  %1819 = vmatmul.mubr.bf16.gmra.mxu0 %v3123_v62  ;;  %v1387_v46 = vshll.u32 %v3123_v62, 16  ;;  %v1926_v3 = vrot.slane %v3123_v62, 1  ;;  %v1399_v32 = vshrl.u32 %v3123_v62, 16 }
 0x17a   :  { %v1202_v55 = vsel %vm100_vm2, %v1191_v42, %v1201_v25  ;;  %v1152_v22 = vmax.f32 %v1134_v28, 0.0  ;;  %v1111_v56 = vadd.f32 %v1066_v30, %v3054_v52  ;;  %2047 = vmatpush1.bf16.msra.mxu1 %v2508_v4  ;;  %2428 = vmatprep.mubr.msk.bf16.mxu0 %vm61_vm0, %v3102_v33  ;;  %v1423_v52 = vshrl.u32 %v3102_v33, 16  ;;  %v1283_v42 = vld [vmem:[#allocation2 + $0xb8] sm:$0xff]  ;;  %v2511_v4 = vld [vmem:[#allocation8 + $0xa8] sm:$0xff]  }
 0x17b   :  { %v1068_v14 = vpop.f32.mrf.mxu0  ;;  %v1389_v58 = vrot.slane %v1387_v46, 1  ;;  %2048 = vmatprep.subr.bf16.mxu1 %v2610_v0  ;;  %v3140_v59 = vsel %vm145_vm5, %v1921_v6, %v1926_v3  ;;  %v3160_v51 = vpack.c.bf16 %v1283_v42, %v1281_v23 }
 0x17c   :  { %v1203_v60 = vrot.slane %v1152_v22, 7  ;;  %v1135_v17 = vadd.f32 %v3075_v11, %v1111_v56  ;;  %v1425_v8 = vor.u32 %v1423_v52, %v1413_v10  ;;  %v2512_v22 = vld [vmem:[#allocation8 + $0xa0] sm:$0xff]  }
 0x17d   :  { %v1071_v27 = vpop.f32.mrf.mxu0  ;;  %v1390_v20 = vsel %vm310_vm1, %v1385_v48, %v1389_v58  ;;  %v1401_v47 = vor.u32 %v1399_v32, %v1389_v58  ;;  %v1285_v48 = vld [vmem:[#allocation2 + $0xc8] sm:$0xff]  ;;  %v1287_v58 = vld [vmem:[#allocation2 + $0xd8] sm:$0xff] }
 0x17e   :  { %v1204_v53 = vsel %vm100_vm2, %v1201_v25, %v1203_v60  ;;  %v1153_v5 = vmax.f32 %v1135_v17, 0.0  ;;  %v1112_v21 = vadd.f32 %v1071_v27, %v3056_v49  ;;  %1632 = vmatmul.mubr.bf16.gmra.mxu1 %v1390_v20  ;;  %v1272_v16 = vld [vmem:[#allocation2 + $0x60] sm:$0xff] }
 0x17f   :  { %1210 = vst [vmem:[#allocation2 + $0x80] sm:$0x7f] %v1204_v53  ;;  %v1073_v6 = vpop.f32.mrf.mxu0  ;;  %v3148_v44 = vpack.c.bf16 %v1202_v55, %v1272_v16  ;;  %2409 = vmatprep.mubr.msk.bf16.mxu1 %vm61_vm0, %v1414_v43  ;;  %2049 = vmatpush1.bf16.msra.mxu1 %v2509_v50  ;;  %v1443_v55 = vshll.u32 %v3160_v51, 16 }
 0x180   :  { %v1213_v13 = vrot.slane %v1153_v5, 7  ;;  %v1136_v31 = vadd.f32 %v3075_v11, %v1112_v21  ;;  %2050 = vmatprep.subr.bf16.mxu1 %v2610_v0  ;;  %v3184_v5 = vpack.c.bf16 %v1287_v58, %v1285_v48  ;;  %v2513_v21 = vld [vmem:[#allocation8 + $0x98] sm:$0xff]  }
 0x181   :  { %v1074_v49 = vpop.f32.mrf.mxu0  ;;  %1827 = vmatmul.mubr.bf16.gmra.mxu0 %v3148_v44  ;;  %v1403_v41 = vshll.u32 %v3148_v44, 16  ;;  %v1930_v36 = vrot.slane %v3148_v44, 1  ;;  %v1415_v27 = vshrl.u32 %v3148_v44, 16  ;;  %v1445_v53 = vrot.slane %v1443_v55, 1  ;;  %v2515_v55 = vld [vmem:[#allocation8 + $0xd0] sm:$0xff]  }
 0x182   :  { %1219 = vst [vmem:[#allocation2 + $0x90] sm:$0xfe] %v1213_v13  ;;  %v1154_v18 = vmax.f32 %v1136_v31, 0.0  ;;  %v1113_v61 = vadd.f32 %v1074_v49, %v3058_v2  ;;  %2429 = vmatprep.mubr.msk.bf16.mxu0 %vm61_vm0, %v3127_v29  ;;  %v1430_v2 = vsel %vm310_vm1, %v1425_v8, %v1429_v19 }
 0x183   :  { %v1076_v45 = vpop.f32.mrf.mxu0  ;;  %v1405_v26 = vrot.slane %v1403_v41, 1  ;;  %2051 = vmatpush1.bf16.msra.mxu1 %v2510_v39  ;;  %v3165_v35 = vsel %vm145_vm5, %v1926_v3, %v1930_v36  ;;  %v1439_v3 = vshrl.u32 %v3127_v29, 16  ;;  %v1455_v41 = vshrl.u32 %v3160_v51, 16 }
 0x184   :  { %v1214_v62 = vrot.slane %v1154_v18, 7  ;;  %v1137_v57 = vadd.f32 %v3075_v11, %v1113_v61  ;;  %2052 = vmatprep.subr.bf16.mxu1 %v2610_v0  ;;  %v1459_v18 = vshll.u32 %v3184_v5, 16  ;;  %v2514_v61 = vld [vmem:[#allocation8 + $0x90] sm:$0xff]  }
 0x185   :  { %v1079_v10 = vpop.f32.mrf.mxu0  ;;  %v1406_v25 = vsel %vm310_vm1, %v1401_v47, %v1405_v26  ;;  %v1441_v20 = vor.u32 %v1439_v3, %v1429_v19 }
 0x186   :  { %v3172_v28 = vsel %vm100_vm2, %v1213_v13, %v1214_v62  ;;  %1221 = vst [vmem:[#allocation2 + $0xb0] sm:$0x1] %v1214_v62  ;;  %v1155_v30 = vmax.f32 %v1137_v57, 0.0  ;;  %v1114_v38 = vadd.f32 %v1079_v10, %v3060_v40  ;;  %1640 = vmatmul.mubr.bf16.gmra.mxu1 %v1406_v25  ;;  %v1276_v50 = vld [vmem:[#allocation2 + $0x80] sm:$0xff]  ;;  %v1417_v13 = vor.u32 %v1415_v27, %v1405_v26  ;;  %v1289_v57 = vld [vmem:[#allocation2 + $0xe8] sm:$0xff] }
 0x187   :  { %v1081_v46 = vpop.f32.mrf.mxu0  ;;  %2410 = vmatprep.mubr.msk.bf16.mxu1 %vm61_vm0, %v1430_v2  ;;  %2053 = vmatpush1.bf16.msra.mxu1 %v2511_v4  ;;  %v1446_v32 = vsel %vm310_vm1, %v1441_v20, %v1445_v53  ;;  %v1291_v2 = vld [vmem:[#allocation2 + $0xf8] sm:$0xff]  ;;  %v1461_v3 = vrot.slane %v1459_v18, 1 }
 0x188   :  { %v1225_v56 = vrot.slane %v1155_v30, 7  ;;  %v1138_v14 = vadd.f32 %v3075_v11, %v1114_v38  ;;  %2054 = vmatprep.subr.bf16.mxu1 %v2610_v0  ;;  %v1457_v46 = vor.u32 %v1455_v41, %v1445_v53  ;;  %v3214_v48 = vpack.c.bf16 %v1291_v2, %v1289_v57 }
 0x189   :  { %v1082_v43 = vpop.f32.mrf.mxu0  ;;  %v1278_v40 = vld [vmem:[#allocation2 + $0x90] sm:$0xff] }
 0x18a   :  { %1233 = vst [vmem:[#allocation2 + $0xb0] sm:$0xf8] %v1225_v56  ;;  %v1156_v60 = vmax.f32 %v1138_v14, 0.0  ;;  %v1115_v17 = vadd.f32 %v1082_v43, %v3062_v15  ;;  %v3181_v52 = vpack.c.bf16 %v1278_v40, %v1276_v50 }
 0x18b   :  { %v1084_v63 = vpop.f32.mrf.mxu0  ;;  %2055 = vmatpush1.bf16.msra.mxu1 %v2512_v22 }
 0x18c   :  { %v1226_v16 = vrot.slane %v1156_v60, 7  ;;  %v1139_v6 = vadd.f32 %v3075_v11, %v1115_v17  ;;  %1835 = vmatmul.mubr.bf16.gmra.mxu0 %v3181_v52  ;;  %v1419_v39 = vshll.u32 %v3181_v52, 16  ;;  %2056 = vmatprep.subr.bf16.mxu1 %v2610_v0  ;;  %v1934_v31 = vrot.slane %v3181_v52, 1 }
 0x18d   :  { %v1087_v15 = vpop.f32.mrf.mxu0  ;;  %2430 = vmatprep.mubr.msk.bf16.mxu0 %vm61_vm0, %v3160_v51  ;;  %v1431_v38 = vshrl.u32 %v3181_v52, 16  ;;  %v1462_v52 = vsel %vm310_vm1, %v1457_v46, %v1461_v3  ;;  %v1471_v63 = vshrl.u32 %v3184_v5, 16 }
 0x18e   :  { %v3194_v8 = vsel %vm100_vm2, %v1225_v56, %v1226_v16  ;;  %v1157_v19 = vmax.f32 %v1139_v6, 0.0  ;;  %v1116_v23 = vadd.f32 %v1087_v15, %v3064_v54  ;;  %v1421_v42 = vrot.slane %v1419_v39, 1  ;;  %v1335_v6 = vld [vmem:[#allocation2 + $0x118] sm:$0x7f] }
 0x18f   :  { %v1089_v49 = vpop.f32.mrf.mxu0  ;;  %2057 = vmatpush1.bf16.msra.mxu1 %v2513_v21  ;;  %v3203_v45 = vsel %vm145_vm5, %v1930_v36, %v1934_v31  ;;  %v1475_v21 = vshll.u32 %v3214_v48, 16 }
 0x190   :  { %v1228_v47 = vrot.slane %v1157_v19, 7  ;;  %v1140_v26 = vadd.f32 %v3075_v11, %v1116_v23  ;;  %v1422_v54 = vsel %vm310_vm1, %v1417_v13, %v1421_v42  ;;  %2058 = vmatprep.subr.bf16.mxu1 %v2610_v0 }
 0x191   :  { %v1090_v4 = vpop.f32.mrf.mxu0  ;;  %1648 = vmatmul.mubr.bf16.gmra.mxu1 %v1422_v54  ;;  %v1282_v62 = vld [vmem:[#allocation2 + $0xb0] sm:$0xff]  ;;  %v1477_v41 = vrot.slane %v1475_v21, 1 }
 0x192   :  { %v1229_v10 = vsel %vm100_vm2, %v1226_v16, %v1228_v47  ;;  %1245 = vst [vmem:[#allocation2 + $0xd0] sm:$0xe0] %v1228_v47  ;;  %v1158_v25 = vmax.f32 %v1140_v26, 0.0  ;;  %v1117_v44 = vadd.f32 %v1090_v4, %v3066_v34  ;;  %v1306_v36 = vpack.c.bf16 %v1282_v62, %v3172_v28  ;;  %2411 = vmatprep.mubr.msk.bf16.mxu1 %vm61_vm0, %v1446_v32 }
 0x193   :  { %1235 = vst [vmem:[#allocation2 + $0xd0] sm:$0x7] %v1229_v10  ;;  %v1092_v30 = vpop.f32.mrf.mxu0  ;;  %2059 = vmatpush1.bf16.msra.mxu1 %v2514_v61  ;;  %v1433_v28 = vor.u32 %v1431_v38, %v1421_v42  ;;  %v1473_v42 = vor.u32 %v1471_v63, %v1461_v3 }
 0x194   :  { %v1238_v22 = vrot.slane %v1158_v25, 7  ;;  %v1141_v56 = vadd.f32 %v3075_v11, %v1117_v44  ;;  %1843 = vmatmul.mubr.bf16.gmra.mxu0 %v1306_v36  ;;  %v1435_v14 = vshll.u32 %v1306_v36, 16  ;;  %2074 = vmatprep.subr.bf16.mxu1 %v2610_v0  ;;  %v1938_v58 = vrot.slane %v1306_v36, 1 }
 0x195   :  { %v1095_v34 = vpop.f32.mrf.mxu0  ;;  %2431 = vmatprep.mubr.msk.bf16.mxu0 %vm61_vm0, %v3184_v5  ;;  %v1447_v61 = vshrl.u32 %v1306_v36, 16  ;;  %v1478_v10 = vsel %vm310_vm1, %v1473_v42, %v1477_v41  ;;  %v1487_v25 = vshrl.u32 %v3214_v48, 16 }
 0x196   :  { %v1239_v43 = vsel %vm100_vm2, %v1228_v47, %v1238_v22  ;;  %v1159_v50 = vmax.f32 %v1141_v56, 0.0  ;;  %v1118_v40 = vadd.f32 %v1095_v34, %v3068_v1  ;;  %v1437_v60 = vrot.slane %v1435_v14, 1  ;;  %v3229_v1 = vld [vmem:[#allocation2 + $0x108] sm:$0xff] }
 0x197   :  { %v1097_v17 = vpop.f32.mrf.mxu0  ;;  %2075 = vmatpush2.bf16.msra.mxu1 %v2515_v55  ;;  %v3224_v0 = vsel %vm145_vm5, %v1934_v31, %v1938_v58  ;;  %v1339_v18 = vpack.c.bf16 %v1335_v6, %v3229_v1  ;;  %v1489_v55 = vor.u32 %v1487_v25, %v1477_v41  ;;  %v1876_v6 = vld [vmem:[#allocation2 + $0x8] sm:$0xfc] }
 0x198   :  { %v1240_v27 = vrot.slane %v1159_v50, 7  ;;  %v1142_v20 = vadd.f32 %v3075_v11, %v1118_v40  ;;  %v1438_v53 = vsel %vm310_vm1, %v1433_v28, %v1437_v60  ;;  %v1449_v4 = vor.u32 %v1447_v61, %v1437_v60 }
 0x199   :  { %v1098_v16 = vpop.f32.mrf.mxu0  ;;  %1656 = vmatmul.mubr.bf16.gmra.mxu1 %v1438_v53  ;;  %v1491_v44 = vshll.u32 %v1339_v18, 16 }
 0x19a   :  { %v1241_v39 = vsel %vm100_vm2, %v1238_v22, %v1240_v27  ;;  %1257 = vst [vmem:[#allocation2 + $0xf0] sm:$0x80] %v1240_v27  ;;  %v1160_v15 = vmax.f32 %v1142_v20, 0.0  ;;  %v1119_v13 = vadd.f32 %v1098_v16, %v3070_v7  ;;  %v1286_v31 = vld [vmem:[#allocation2 + $0xd0] sm:$0xff]  ;;  %2412 = vmatprep.mubr.msk.bf16.mxu1 %vm61_vm0, %v1462_v52  ;;  %v1498_v20 = vshrl.u32 %v1339_v18, 16 }
 0x19b   :  { %1247 = vst [vmem:[#allocation2 + $0xf0] sm:$0x1f] %v1241_v39  ;;  %v1100_v19 = vpop.f32.mrf.mxu0  ;;  %v1308_v23 = vpack.c.bf16 %v1286_v31, %v3194_v8  ;;  %v1295_v8 = vld [vmem:[#allocation2 + $0x118] sm:$0x3f]  ;;  %v1493_v22 = vrot.slane %v1491_v44, 1 }
 0x19c   :  { %v1250_v49 = vrot.slane %v1160_v15, 7  ;;  %v1143_v32 = vadd.f32 %v3075_v11, %v1119_v13  ;;  %v1313_v46 = vpack.c.bf16 %v1295_v8, %v3229_v1 }
 0x19d   :  { %1851 = vmatmul.mubr.bf16.gmra.mxu0 %v1308_v23  ;;  %v1451_v47 = vshll.u32 %v1308_v23, 16  ;;  %v1942_v26 = vrot.slane %v1308_v23, 1  ;;  %v1463_v56 = vshrl.u32 %v1308_v23, 16  ;;  %v1494_v40 = vsel %vm310_vm1, %v1489_v55, %v1493_v22 }
 0x19e   :  { %v1251_v7 = vsel %vm100_vm2, %v1240_v27, %v1250_v49  ;;  %v1161_v54 = vmax.f32 %v1143_v32, 0.0  ;;  %2432 = vmatprep.mubr.msk.bf16.mxu0 %vm61_vm0, %v3214_v48  ;;  %v1500_v31 = vor.u32 %v1498_v20, %v1493_v22  ;;  %v1880_v23 = vpack.c.bf16 %v3019_v12, %v1876_v6 }
 0x19f   :  { %v1453_v62 = vrot.slane %v1451_v47, 1  ;;  %v3241_v57 = vsel %vm145_vm5, %v1938_v58, %v1942_v26  ;;  %v1924_v32 = vrot.slane %v3026_v37, 1  ;;  %v1928_v47 = vrot.slane %v3087_v9, 1 }
 0x1a0   :  { %v1252_v2 = vrot.slane %v1161_v54, 7  ;;  %v1932_v12 = vrot.slane %v3102_v33, 1  ;;  %v1936_v37 = vrot.slane %v3127_v29, 1  ;;  %v1940_v9 = vrot.slane %v3160_v51, 1 }
 0x1a1   :  { %v1454_v36 = vsel %vm310_vm1, %v1449_v4, %v1453_v62  ;;  %v1465_v28 = vor.u32 %v1463_v56, %v1453_v62  ;;  %v1944_v33 = vrot.slane %v3184_v5, 1  ;;  %v1948_v29 = vrot.slane %v3214_v48, 1 }
 0x1a2   :  { %v1253_v30 = vsel %vm100_vm2, %v1250_v49, %v1252_v2  ;;  %1664 = vmatmul.mubr.bf16.gmra.mxu1 %v1454_v36  ;;  %v1290_v38 = vld [vmem:[#allocation2 + $0xf0] sm:$0xff]  ;;  %v1923_v49 = vrot.slane %v1880_v23, 1  ;;  %v1937_v54 = vsel %vm145_vm5, %v1932_v12, %v1936_v37 }
 0x1a3   :  { %1259 = vst [vmem:[#allocation2 + $0x110] sm:$0x7f] %v1253_v30  ;;  %v1310_v3 = vpack.c.bf16 %v1290_v38, %v1239_v43  ;;  %2413 = vmatprep.mubr.msk.bf16.mxu1 %vm61_vm0, %v1478_v10  ;;  %v1949_v4 = vsel %vm145_vm5, %v1944_v33, %v1948_v29 }
 0x1a4   :  { %v1925_v61 = vsel %vm145_vm5, %v1923_v49, %v1924_v32 }
 0x1a5   :  { %1859 = vmatmul.mubr.bf16.gmra.mxu0 %v1310_v3  ;;  %v1467_v14 = vshll.u32 %v1310_v3, 16  ;;  %v1946_v34 = vrot.slane %v1310_v3, 1  ;;  %v1479_v21 = vshrl.u32 %v1310_v3, 16 }
 0x1a6   :  { %2433 = vmatprep.mubr.msk.bf16.mxu0 %vm61_vm0, %v1313_v46 }
 0x1a7   :  { %v1469_v58 = vrot.slane %v1467_v14, 1  ;;  %v1947_v50 = vsel %vm145_vm5, %v1942_v26, %v1946_v34  ;;  %v1929_v26 = vsel %vm145_vm5, %v1924_v32, %v1928_v47 }
 0x1a9   :  { %v1470_v60 = vsel %vm310_vm1, %v1465_v28, %v1469_v58  ;;  %v1481_v15 = vor.u32 %v1479_v21, %v1469_v58 }
 0x1aa   :  { %1672 = vmatmul.mubr.bf16.gmra.mxu1 %v1470_v60  ;;  %v1294_v43 = vld [vmem:[#allocation2 + $0x110] sm:$0x3f] }
 0x1ab   :  { %v1334_v17 = vld [vmem:[#allocation2 + $0x110] sm:$0x7f]  ;;  %v1312_v63 = vpack.c.bf16 %v1294_v43, %v1251_v7  ;;  %2414 = vmatprep.mubr.msk.bf16.mxu1 %vm61_vm0, %v1494_v40 }
 0x1ac   :  { %v1877_v52 = vld [vmem:[#allocation2 + $0x110] sm:$0xff]  ;;  %v1338_v27 = vpack.c.bf16 %v1334_v17, %v1251_v7 }
 0x1ad   :  { %v1881_v53 = vpack.c.bf16 %v1877_v52, %v1251_v7  ;;  %1867 = vmatmul.mubr.bf16.gmra.mxu0 %v1312_v63  ;;  %v1933_v7 = vsel %vm145_vm5, %v1928_v47, %v1932_v12 }
 0x1ae   :  { %v1483_v16 = vshll.u32 %v1338_v27, 16  ;;  %v1495_v41 = vshrl.u32 %v1338_v27, 16 }
 0x1af   :  { %v1950_v39 = vrot.slane %v1881_v53, 1 }
 0x1b0   :  { %v1485_v13 = vrot.slane %v1483_v16, 1 }
 0x1b1   :  { %v1951_v19 = vsel %vm145_vm5, %v1946_v34, %v1950_v39 }
 0x1b2   :  { %v1486_v42 = vsel %vm310_vm1, %v1481_v15, %v1485_v13  ;;  %v1497_v18 = vor.u32 %v1495_v41, %v1485_v13 }
 0x1b3   :  { %1680 = vmatmul.mubr.bf16.gmra.mxu1 %v1486_v42 }
 0x1b4   :  { %2415 = vmatprep.mubr.msk.bf16.mxu1 %vm61_vm0, %v1500_v31 }
 0x1bb   :  { %1688 = vmatmul.mubr.bf16.gmra.mxu1 %v1497_v18 }
 0x1bc   :  { %2443 = vmatprep.mubr.msk.bf16.mxu1 %vm61_vm0, %v1925_v61 }
 0x1c3   :  { %2077 = vmatmul.mubr.bf16.vlgmr.msra.gmra.mxu1 %v3116_v24  ;;  %v1941_v24 = vsel %vm145_vm5, %v1936_v37, %v1940_v9 }
 0x1c4   :  { %2444 = vmatprep.mubr.msk.bf16.mxu1 %vm61_vm0, %v1929_v26 }
 0x1cb   :  { %2085 = vmatmul.mubr.bf16.gmra.mxu1 %v3140_v59  ;;  %v1945_v59 = vsel %vm145_vm5, %v1940_v9, %v1944_v33 }
 0x1cc   :  { %2445 = vmatprep.mubr.msk.bf16.mxu1 %vm61_vm0, %v1933_v7 }
 0x1d3   :  { %2093 = vmatmul.mubr.bf16.gmra.mxu1 %v3165_v35  ;;  %v1878_v35 = vld [vmem:[#allocation2 + $0x118] sm:$0xff] }
 0x1d4   :  { %2446 = vmatprep.mubr.msk.bf16.mxu1 %vm61_vm0, %v1937_v54  ;;  %v1882_v51 = vpack.c.bf16 %v1878_v35, %v3229_v1 }
 0x1db   :  { %2101 = vmatmul.mubr.bf16.gmra.mxu1 %v3203_v45  ;;  %v1952_v45 = vrot.slane %v1882_v51, 1 }
 0x1dc   :  { %2447 = vmatprep.mubr.msk.bf16.mxu1 %vm61_vm0, %v1941_v24 }
 0x1dd   :  { %v1953_v5 = vsel %vm145_vm5, %v1948_v29, %v1952_v45 }
 0x1e3   :  { %2109 = vmatmul.mubr.bf16.gmra.mxu1 %v3224_v0 }
 0x1e4   :  { %2448 = vmatprep.mubr.msk.bf16.mxu1 %vm61_vm0, %v1945_v59 }
 0x1eb   :  { %2117 = vmatmul.mubr.bf16.gmra.mxu1 %v3241_v57 }
 0x1ec   :  { %2449 = vmatprep.mubr.msk.bf16.mxu1 %vm61_vm0, %v1949_v4 }
 0x1f3   :  { %2125 = vmatmul.mubr.bf16.gmra.mxu1 %v1947_v50 }
 0x1f4   :  { %2450 = vmatprep.mubr.msk.bf16.mxu1 %vm61_vm0, %v1953_v5 }
 0x1fb   :  { %2133 = vmatmul.mubr.bf16.gmra.mxu1 %v1951_v19 }
 0x1fc   :  { %2451 = vmatprep.mubr.msk.bf16.mxu1 %vm61_vm0, %v1952_v45 }
 0x203   :  { %2141 = vmatmul.mubr.bf16.gmra.mxu1 %v1950_v39 }
 0x228   :  { %v1804_v48 = vpop.f32.mrf.mxu0 }
 0x22a   :  { %v1806_v0 = vpop.f32.mrf.mxu0 }
 0x22c   :  { %v1807_v62 = vpop.f32.mrf.mxu0 }
 0x22e   :  { %v1809_v8 = vpop.f32.mrf.mxu0 }
 0x230   :  { %v1812_v2 = vpop.f32.mrf.mxu0 }
 0x232   :  { %v1814_v1 = vpop.f32.mrf.mxu0 }
 0x234   :  { %v1815_v10 = vpop.f32.mrf.mxu0 }
 0x235   :  { %v1625_v57 = vpop.f32.mrf.mxu1 }
 0x236   :  { %v3289_v25 = vadd.f32 %v1804_v48, %v1625_v57  ;;  %v1817_v44 = vpop.f32.mrf.mxu0 }
 0x237   :  { %v1627_v36 = vpop.f32.mrf.mxu1 }
 0x239   :  { %v1820_v30 = vpop.f32.mrf.mxu0  ;;  %v1628_v38 = vpop.f32.mrf.mxu1 }
 0x23a   :  { %v3291_v46 = vadd.f32 %v1807_v62, %v1628_v38 }
 0x23b   :  { %v1822_v3 = vpop.f32.mrf.mxu0  ;;  %v1630_v55 = vpop.f32.mrf.mxu1 }
 0x23d   :  { %v1823_v22 = vpop.f32.mrf.mxu0 }
 0x23e   :  { %v1633_v56 = vpop.f32.mrf.mxu1 }
 0x23f   :  { %v3293_v14 = vadd.f32 %v1812_v2, %v1633_v56  ;;  %v1825_v34 = vpop.f32.mrf.mxu0 }
 0x240   :  { %v1635_v28 = vpop.f32.mrf.mxu1 }
 0x241   :  { %v1828_v58 = vpop.f32.mrf.mxu0 }
 0x242   :  { %v1636_v50 = vpop.f32.mrf.mxu1 }
 0x243   :  { %v3295_v40 = vadd.f32 %v1815_v10, %v1636_v50  ;;  %v1830_v60 = vpop.f32.mrf.mxu0 }
 0x244   :  { %v1638_v43 = vpop.f32.mrf.mxu1 }
 0x245   :  { %v1831_v17 = vpop.f32.mrf.mxu0 }
 0x246   :  { %v1641_v52 = vpop.f32.mrf.mxu1 }
 0x247   :  { %v3297_v63 = vadd.f32 %v1820_v30, %v1641_v52  ;;  %v1833_v27 = vpop.f32.mrf.mxu0 }
 0x248   :  { %v1643_v20 = vpop.f32.mrf.mxu1 }
 0x24a   :  { %v1644_v53 = vpop.f32.mrf.mxu1 }
 0x24b   :  { %v3299_v21 = vadd.f32 %v1823_v22, %v1644_v53 }
 0x24c   :  { %v1836_v16 = vpop.f32.mrf.mxu0  ;;  %v1646_v6 = vpop.f32.mrf.mxu1 }
 0x24e   :  { %v1838_v39 = vpop.f32.mrf.mxu0 }
 0x24f   :  { %v2185_v39 = vld [vmem:[#allocation3] sm:$0xff] }
 0x250   :  { %v1839_v15 = vpop.f32.mrf.mxu0 }
 0x251   :  { %v1649_v13 = vpop.f32.mrf.mxu1 }
 0x252   :  { %v3301_v31 = vadd.f32 %v1828_v58, %v1649_v13  ;;  %v1841_v19 = vpop.f32.mrf.mxu0 }
 0x253   :  { %v1651_v23 = vpop.f32.mrf.mxu1 }
 0x254   :  { %v1844_v42 = vpop.f32.mrf.mxu0 }
 0x255   :  { %v1652_v49 = vpop.f32.mrf.mxu1 }
 0x256   :  { %v3303_v32 = vadd.f32 %v1831_v17, %v1652_v49  ;;  %v1846_v41 = vpop.f32.mrf.mxu0  ;;  %v2186_v49 = vld [vmem:[#allocation3 + $0x8] sm:$0xff] }
 0x257   :  { %v1654_v18 = vpop.f32.mrf.mxu1 }
 0x258   :  { %v1847_v61 = vpop.f32.mrf.mxu0  ;;  %v2193_v18 = vld [vmem:[#allocation3 + $0x10] sm:$0xff] }
 0x259   :  { %v1657_v47 = vpop.f32.mrf.mxu1 }
 0x25a   :  { %v3305_v26 = vadd.f32 %v1836_v16, %v1657_v47  ;;  %v1849_v12 = vpop.f32.mrf.mxu0 }
 0x25b   :  { %v1659_v7 = vpop.f32.mrf.mxu1  ;;  %v2194_v12 = vld [vmem:[#allocation3 + $0x18] sm:$0xff] }
 0x25d   :  { %v1852_v37 = vpop.f32.mrf.mxu0  ;;  %v1660_v54 = vpop.f32.mrf.mxu1 }
 0x25e   :  { %v3307_v9 = vadd.f32 %v1839_v15, %v1660_v54  ;;  %v2198_v54 = vrot.slane %v2193_v18, 6 }
 0x25f   :  { %v1854_v24 = vpop.f32.mrf.mxu0  ;;  %v1662_v33 = vpop.f32.mrf.mxu1 }
 0x260   :  { %v2199_v33 = vrot.slane %v2194_v12, 6 }
 0x261   :  { %v1855_v59 = vpop.f32.mrf.mxu0 }
 0x262   :  { %v1665_v29 = vpop.f32.mrf.mxu1 }
 0x263   :  { %v3309_v35 = vadd.f32 %v1844_v42, %v1665_v29  ;;  %v1857_v4 = vpop.f32.mrf.mxu0 }
 0x264   :  { %v1667_v51 = vpop.f32.mrf.mxu1 }
 0x265   :  { %v1860_v45 = vpop.f32.mrf.mxu0 }
 0x266   :  { %v1668_v5 = vpop.f32.mrf.mxu1 }
 0x267   :  { %v3311_v48 = vadd.f32 %v1847_v61, %v1668_v5  ;;  %v1862_v0 = vpop.f32.mrf.mxu0 }
 0x268   :  { %v1670_v62 = vpop.f32.mrf.mxu1  ;;  %v2214_v0 = vld [vmem:[#allocation3 + $0x20] sm:$0xff] }
 0x269   :  { %v1863_v8 = vpop.f32.mrf.mxu0 }
 0x26a   :  { %v1673_v2 = vpop.f32.mrf.mxu1 }
 0x26b   :  { %v3313_v1 = vadd.f32 %v1852_v37, %v1673_v2  ;;  %v1865_v10 = vpop.f32.mrf.mxu0  ;;  %v2215_v2 = vld [vmem:[#allocation3 + $0x28] sm:$0xff] }
 0x26c   :  { %v1675_v57 = vpop.f32.mrf.mxu1 }
 0x26d   :  { %v1868_v44 = vpop.f32.mrf.mxu0 }
 0x26e   :  { %v1676_v36 = vpop.f32.mrf.mxu1 }
 0x26f   :  { %v3315_v30 = vadd.f32 %v1855_v59, %v1676_v36  ;;  %v1870_v38 = vpop.f32.mrf.mxu0  ;;  %v2220_v36 = vrot.slane %v2215_v2, 4 }
 0x270   :  { %v1678_v3 = vpop.f32.mrf.mxu1 }
 0x271   :  { %v1871_v55 = vpop.f32.mrf.mxu0 }
 0x273   :  { %v1681_v22 = vpop.f32.mrf.mxu1  ;;  %v1873_v34 = vpop.f32.mrf.mxu0 }
 0x274   :  { %v3317_v56 = vadd.f32 %v1860_v45, %v1681_v22  ;;  %v2200_v45 = vsel %vm2197_vm6, %v2198_v54, %v2199_v33 }
 0x275   :  { %v1683_v28 = vpop.f32.mrf.mxu1 }
 0x277   :  { %v1684_v58 = vpop.f32.mrf.mxu1 }
 0x278   :  { %v3319_v50 = vadd.f32 %v1863_v8, %v1684_v58 }
 0x279   :  { %v1686_v60 = vpop.f32.mrf.mxu1 }
 0x27b   :  { %v1689_v43 = vpop.f32.mrf.mxu1 }
 0x27c   :  { %v3321_v17 = vadd.f32 %v1868_v44, %v1689_v43  ;;  %v2219_v44 = vrot.slane %v2214_v0, 4  ;;  %v2235_v43 = vld [vmem:[#allocation3 + $0x30] sm:$0xff] }
 0x27d   :  { %v1691_v52 = vpop.f32.mrf.mxu1 }
 0x27e   :  { %v2221_v58 = vsel %vm2218_vm7, %v2219_v44, %v2220_v36 }
 0x27f   :  { %v1692_v27 = vpop.f32.mrf.mxu1 }
 0x280   :  { %v3323_v20 = vadd.f32 %v1871_v55, %v1692_v27 }
 0x281   :  { %v1694_v53 = vpop.f32.mrf.mxu1 }
 0x282   :  { %v2236_v53 = vld [vmem:[#allocation3 + $0x38] sm:$0xff] }
 0x283   :  { %v2078_v16 = vpop.f32.mrf.mxu1 }
 0x284   :  { %v2149_v6 = vadd.f32 %v2078_v16, %v3289_v25 }
 0x285   :  { %v2080_v15 = vpop.f32.mrf.mxu1 }
 0x286   :  { %v2167_v13 = vadd.f32 %v3075_v11, %v2149_v6  ;;  %v2240_v15 = vrot.slane %v2235_v43, 2 }
 0x287   :  { %v2081_v19 = vpop.f32.mrf.mxu1 }
 0x288   :  { %v2187_v23 = vadd.f32 %v2185_v39, %v2167_v13  ;;  %v2150_v42 = vadd.f32 %v2081_v19, %v3291_v46  ;;  %v2241_v19 = vrot.slane %v2236_v53, 2  ;;  %v2286_v53 = vld [vmem:[#allocation3 + $0x68] sm:$0xff] }
 0x289   :  { %v2083_v41 = vpop.f32.mrf.mxu1 }
 0x28a   :  { %v2189_v61 = vmax.f32 %v2187_v23, 0.0  ;;  %v2168_v47 = vadd.f32 %v3075_v11, %v2150_v42 }
 0x28b   :  { %v2086_v7 = vpop.f32.mrf.mxu1 }
 0x28c   :  { %2191 = vst [vmem:[#allocation9] sm:$0xff] %v2189_v61  ;;  %v2188_v37 = vadd.f32 %v2186_v49, %v2168_v47  ;;  %v2151_v25 = vadd.f32 %v2086_v7, %v3293_v14  ;;  %v3336_v14 = vld [vmem:[%s3381_s3] ss:$0 sm:$0xff]  ;;  %v2242_v61 = vsel %vm2239_vm8, %v2240_v15, %v2241_v19  ;;  %s2612_s3 = smov [#allocation9]  }
 0x28d   :  { %v2088_v24 = vpop.f32.mrf.mxu1  ;;  %s2330_s9 = sshll.u32 %s2612_s3, 4  ;;  %s2331_s9 = int_to_ptr.vmem [resolvable:$true] %s2330_s9 }
 0x28e   :  { %v2190_v59 = vmax.f32 %v2188_v37, 0.0  ;;  %v2169_v29 = vadd.f32 %v3075_v11, %v2151_v25  ;;  %s2577_s10 = scalar_lea.vmem %s2331_s9, 2048  ;;  %p2582_p2 = scmp.lt.s32.totalorder %s2331_s9, %s2331_s9 }
 0x28f   :  { %v2089_v46 = vpop.f32.mrf.mxu1  ;;  %p2578_p1 = scmp.ne.s32.totalorder %s2331_s9, %s2577_s10  ;;  %p2583_p3 = scmp.lt.s32.totalorder %s2577_s10, %s2577_s10 }
 0x290   :  { %2192 = vst [vmem:[#allocation9 + $0x8] sm:$0xff] %v2190_v59  ;;  %v2204_v4 = vadd.f32 %v2198_v54, %v2169_v29  ;;  %v2152_v51 = vadd.f32 %v2089_v46, %v3295_v40 }
 0x291   :  { %v2091_v5 = vpop.f32.mrf.mxu1  ;;  %p2584_p4 = por %p2583_p3, %p2582_p2 }
 0x292   :  { %v2207_v62 = vmax.f32 %v2204_v4, 0.0  ;;  %v2170_v8 = vadd.f32 %v3336_v14, %v2152_v51  ;;  %v2256_v4 = vld [vmem:[#allocation3 + $0x40] sm:$0xff] }
 0x293   :  { %v2094_v11 = vpop.f32.mrf.mxu1  ;;  %p2585_p5 = pnand %p2584_p4, %p2578_p1 }
 0x294   :  { %2211 = vst [vmem:[#allocation9 + $0xe] sm:$0xfc] %v2207_v62  ;;  %v2205_v10 = vadd.f32 %v2200_v45, %v2170_v8  ;;  %v2153_v57 = vadd.f32 %v2094_v11, %v3297_v63  ;;  %v2265_v11 = vld [vmem:[#allocation3 + $0x50] sm:$0xff] }
 0x295   :  { %v2096_v40 = vpop.f32.mrf.mxu1 }
 0x296   :  { %v2208_v38 = vmax.f32 %v2205_v10, 0.0  ;;  %v2171_v3 = vadd.f32 %v3336_v14, %v2153_v57 }
 0x297   :  { %v2097_v55 = vpop.f32.mrf.mxu1 }
 0x298   :  { %2212 = vst [vmem:[#allocation9 + $0x16] sm:$0xff] %v2208_v38  ;;  %v2206_v22 = vadd.f32 %v2199_v33, %v2171_v3  ;;  %v2225_v34 = vadd.f32 %v2219_v44, %v2171_v3  ;;  %v2154_v28 = vadd.f32 %v2097_v55, %v3299_v21  ;;  %v2266_v44 = vld [vmem:[#allocation3 + $0x58] sm:$0xff]  ;;  %v2269_v38 = vrot.slane %v2265_v11, 6 }
 0x299   :  { %v2099_v60 = vpop.f32.mrf.mxu1  ;;  %v2270_v55 = vrot.slane %v2266_v44, 6 }
 0x29a   :  { %v2209_v52 = vmax.f32 %v2206_v22, 0.0  ;;  %v2228_v27 = vmax.f32 %v2225_v34, 0.0  ;;  %v2172_v63 = vadd.f32 %v3336_v14, %v2154_v28 }
 0x29b   :  { %v2102_v16 = vpop.f32.mrf.mxu1  ;;  %v2271_v60 = vsel %vm2197_vm6, %v2269_v38, %v2270_v55 }
 0x29c   :  { %2213 = vst [vmem:[#allocation9 + $0x1e] sm:$0x3] %v2209_v52  ;;  %2232 = vst [vmem:[#allocation9 + $0x1c] sm:$0xf0] %v2228_v27  ;;  %v2226_v6 = vadd.f32 %v2221_v58, %v2172_v63  ;;  %v2155_v39 = vadd.f32 %v2102_v16, %v3301_v31  ;;  %v2285_v52 = vld [vmem:[#allocation3 + $0x60] sm:$0xff] }
 0x29d   :  { %v2104_v13 = vpop.f32.mrf.mxu1 }
 0x29e   :  { %v2229_v23 = vmax.f32 %v2226_v6, 0.0  ;;  %v2173_v21 = vadd.f32 %v3336_v14, %v2155_v39  ;;  %v2289_v39 = vrot.slane %v2285_v52, 4  ;;  %v2290_v13 = vrot.slane %v2286_v53, 4 }
 0x29f   :  { %v2105_v42 = vpop.f32.mrf.mxu1 }
 0x2a0   :  { %2233 = vst [vmem:[#allocation9 + $0x24] sm:$0xff] %v2229_v23  ;;  %v2227_v49 = vadd.f32 %v2220_v36, %v2173_v21  ;;  %v2246_v41 = vadd.f32 %v2240_v15, %v2173_v21  ;;  %v2156_v18 = vadd.f32 %v2105_v42, %v3303_v32 }
 0x2a1   :  { %v2107_v47 = vpop.f32.mrf.mxu1 }
 0x2a2   :  { %v2230_v12 = vmax.f32 %v2227_v49, 0.0  ;;  %v2249_v7 = vmax.f32 %v2246_v41, 0.0  ;;  %v2174_v31 = vadd.f32 %v3336_v14, %v2156_v18  ;;  %v2291_v41 = vsel %vm2218_vm7, %v2289_v39, %v2290_v13 }
 0x2a3   :  { %v2110_v37 = vpop.f32.mrf.mxu1 }
 0x2a4   :  { %2234 = vst [vmem:[#allocation9 + $0x2c] sm:$0xf] %v2230_v12  ;;  %2253 = vst [vmem:[#allocation9 + $0x2a] sm:$0xc0] %v2249_v7  ;;  %v2247_v25 = vadd.f32 %v2242_v61, %v2174_v31  ;;  %v2157_v54 = vadd.f32 %v2110_v37, %v3305_v26  ;;  %v2257_v26 = vld [vmem:[#allocation3 + $0x48] sm:$0xff]  ;;  %v2305_v61 = vld [vmem:[#allocation3 + $0x70] sm:$0xff] }
 0x2a5   :  { %v2112_v24 = vpop.f32.mrf.mxu1  ;;  %v2306_v7 = vld [vmem:[#allocation3 + $0x78] sm:$0xff] }
 0x2a6   :  { %v2250_v33 = vmax.f32 %v2247_v25, 0.0  ;;  %v2175_v59 = vadd.f32 %v3336_v14, %v2157_v54  ;;  %v2309_v54 = vrot.slane %v2305_v61, 2 }
 0x2a7   :  { %v2113_v29 = vpop.f32.mrf.mxu1 }
 0x2a8   :  { %2254 = vst [vmem:[#allocation9 + $0x32] sm:$0xff] %v2250_v33  ;;  %v2248_v32 = vadd.f32 %v2241_v19, %v2175_v59  ;;  %v2158_v46 = vadd.f32 %v2113_v29, %v3307_v9  ;;  %v2310_v33 = vrot.slane %v2306_v7, 2 }
 0x2a9   :  { %v2115_v51 = vpop.f32.mrf.mxu1 }
 0x2aa   :  { %v2251_v45 = vmax.f32 %v2248_v32, 0.0  ;;  %v2176_v5 = vadd.f32 %v3336_v14, %v2158_v46  ;;  %v2311_v51 = vsel %vm2239_vm8, %v2309_v54, %v2310_v33 }
 0x2ab   :  { %v2118_v0 = vpop.f32.mrf.mxu1 }
 0x2ac   :  { %2255 = vst [vmem:[#allocation9 + $0x3a] sm:$0x3f] %v2251_v45  ;;  %v2258_v62 = vadd.f32 %v2256_v4, %v2176_v5  ;;  %v2159_v8 = vadd.f32 %v2118_v0, %v3309_v35 }
 0x2ad   :  { %v2120_v2 = vpop.f32.mrf.mxu1 }
 0x2ae   :  { %v2260_v10 = vmax.f32 %v2258_v62, 0.0  ;;  %v2177_v57 = vadd.f32 %v3336_v14, %v2159_v8 }
 0x2af   :  { %v2121_v40 = vpop.f32.mrf.mxu1 }
 0x2b0   :  { %2263 = vst [vmem:[#allocation9 + $0x40] sm:$0xff] %v2260_v10  ;;  %v2259_v9 = vadd.f32 %v2257_v26, %v2177_v57  ;;  %v2160_v36 = vadd.f32 %v2121_v40, %v3311_v48 }
 0x2b1   :  { %v2123_v3 = vpop.f32.mrf.mxu1 }
 0x2b2   :  { %v2261_v22 = vmax.f32 %v2259_v9, 0.0  ;;  %v2178_v34 = vadd.f32 %v3336_v14, %v2160_v36 }
 0x2b3   :  { %v2126_v28 = vpop.f32.mrf.mxu1 }
 0x2b4   :  { %2264 = vst [vmem:[#allocation9 + $0x48] sm:$0xff] %v2261_v22  ;;  %v2275_v35 = vadd.f32 %v2269_v38, %v2178_v34  ;;  %v2161_v58 = vadd.f32 %v2126_v28, %v3313_v1 }
 0x2b5   :  { %v2128_v43 = vpop.f32.mrf.mxu1 }
 0x2b6   :  { %v2278_v27 = vmax.f32 %v2275_v35, 0.0  ;;  %v2179_v63 = vadd.f32 %v3336_v14, %v2161_v58 }
 0x2b7   :  { %v2129_v48 = vpop.f32.mrf.mxu1 }
 0x2b8   :  { %2282 = vst [vmem:[#allocation9 + $0x4e] sm:$0xfc] %v2278_v27  ;;  %v2276_v16 = vadd.f32 %v2271_v60, %v2179_v63  ;;  %v2162_v6 = vadd.f32 %v2129_v48, %v3315_v30 }
 0x2b9   :  { %v2131_v15 = vpop.f32.mrf.mxu1 }
 0x2ba   :  { %v2279_v19 = vmax.f32 %v2276_v16, 0.0  ;;  %v2180_v23 = vadd.f32 %v3336_v14, %v2162_v6 }
 0x2bb   :  { %v2134_v1 = vpop.f32.mrf.mxu1 }
 0x2bc   :  { %2283 = vst [vmem:[#allocation9 + $0x56] sm:$0xff] %v2279_v19  ;;  %v2277_v21 = vadd.f32 %v2270_v55, %v2180_v23  ;;  %v2295_v42 = vadd.f32 %v2289_v39, %v2180_v23  ;;  %v2163_v49 = vadd.f32 %v2134_v1, %v3317_v56 }
 0x2bd   :  { %v2136_v18 = vpop.f32.mrf.mxu1 }
 0x2be   :  { %v2280_v47 = vmax.f32 %v2277_v21, 0.0  ;;  %v2298_v12 = vmax.f32 %v2295_v42, 0.0  ;;  %v2181_v30 = vadd.f32 %v3336_v14, %v2163_v49 }
 0x2bf   :  { %v2137_v31 = vpop.f32.mrf.mxu1 }
 0x2c0   :  { %2284 = vst [vmem:[#allocation9 + $0x5e] sm:$0x3] %v2280_v47  ;;  %2302 = vst [vmem:[#allocation9 + $0x5c] sm:$0xf0] %v2298_v12  ;;  %v2296_v37 = vadd.f32 %v2291_v41, %v2181_v30  ;;  %v2164_v25 = vadd.f32 %v2137_v31, %v3319_v50 }
 0x2c1   :  { %v2139_v24 = vpop.f32.mrf.mxu1 }
 0x2c2   :  { %v2299_v59 = vmax.f32 %v2296_v37, 0.0  ;;  %v2182_v56 = vadd.f32 %v3336_v14, %v2164_v25 }
 0x2c3   :  { %v2142_v29 = vpop.f32.mrf.mxu1 }
 0x2c4   :  { %2303 = vst [vmem:[#allocation9 + $0x64] sm:$0xff] %v2299_v59  ;;  %v2297_v32 = vadd.f32 %v2290_v13, %v2182_v56  ;;  %v2315_v46 = vadd.f32 %v2309_v54, %v2182_v56  ;;  %v2165_v4 = vadd.f32 %v2142_v29, %v3321_v17 }
 0x2c5   :  { %v2144_v45 = vpop.f32.mrf.mxu1 }
 0x2c6   :  { %v2300_v5 = vmax.f32 %v2297_v32, 0.0  ;;  %v2318_v0 = vmax.f32 %v2315_v46, 0.0  ;;  %v2183_v62 = vadd.f32 %v3336_v14, %v2165_v4 }
 0x2c7   :  { %v2145_v50 = vpop.f32.mrf.mxu1 }
 0x2c8   :  { %2304 = vst [vmem:[#allocation9 + $0x6c] sm:$0xf] %v2300_v5  ;;  %2322 = vst [vmem:[#allocation9 + $0x6a] sm:$0xc0] %v2318_v0  ;;  %v2316_v8 = vadd.f32 %v2311_v51, %v2183_v62  ;;  %v2166_v26 = vadd.f32 %v2145_v50, %v3323_v20 }
 0x2c9   :  { %v2147_v2 = vpop.f32.mrf.mxu1 }
 0x2ca   :  { %v2319_v11 = vmax.f32 %v2316_v8, 0.0  ;;  %v2184_v10 = vadd.f32 %v3336_v14, %v2166_v26 }
 0x2cc   :  { %2323 = vst [vmem:[#allocation9 + $0x72] sm:$0xff] %v2319_v11  ;;  %v2317_v17 = vadd.f32 %v2310_v33, %v2184_v10 }
 0x2ce   :  { %v2320_v57 = vmax.f32 %v2317_v17, 0.0 }
 0x2d0   :  { %2324 = vst [vmem:[#allocation9 + $0x7a] sm:$0x3f] %v2320_v57 }
 0x2d1   :  { %2588 = shalt.err (!%p2585_p5)
}
 0x2d2   :  { %2336 = dma.vmem_to_hbm [thread:$0]  %s2331_s9, 2048, %s3382_s4, [#allocation5], %s2607_s25, %s2607_s25, %s2608_s26  }
 0x2d3   :  { %2601 = dma.done.wait [#allocation5], 2048  }
 0x2d4   :  { %2602 = vsyncadd [#allocation5], 4294965248 }
 0x2d5   :  { %2340 = vsyncpa [#allocation4], 1 }
 0x2d6   :  { %2341 = vsyncpa [#allocation7], 1 }
 0x2d7   :  { %2342 = vsyncpa [#allocation5], 1 }

</bundles_post_ra>
